<compile_context>
chip_gen: v7x
topology: tpu7x:2x2x1
jax: 0.10.0
libtpu: 0.0.40
codegen_flags: <defaults>
</compile_context>

<pallas_src>
import math

import jax
import jax.numpy as jnp
from jax.experimental import pallas as pl
from jax.experimental.pallas import tpu as pltpu


# ----------------------------------------------------------------------------
# Kernel
# ----------------------------------------------------------------------------
def make_tsp_encoder_kernel(head_num: int, qkv_dim: int, n: int, tb: int):
    H, D, N, TB = head_num, qkv_dim, n, tb
    HD = H * D
    ROWS = TB * N

    def kernel(data_ref, we_ref, be_ref, wqkv_ref, wc_ref, bc_ref,
               w1_ref, b1_ref, w2_ref, b2_ref, o_ref, cat_ref):
        # ---- node embedding on the VPU (a K=2 MXU contraction is pure waste):
        #      x = d0 * We[0,:] + d1 * We[1,:] + be                (f32)
        d = data_ref[...]                                          # (ROWS, 2)
        x = (d[:, 0:1] * we_ref[0:1, :]
             + d[:, 1:2] * we_ref[1:2, :]
             + be_ref[...])                                        # (ROWS, E) f32
        x_bf = x.astype(jnp.bfloat16)

        # ---- fused QKV projection: ONE wide MXU matmul (E -> 3*H*D) ----
        #      (1/sqrt(D) scale pre-folded into the Wq third of the slab)
        qkv = jnp.dot(x_bf, wqkv_ref[...],
                      preferred_element_type=jnp.float32)          # (ROWS, 3*HD) f32

        # ---- per-head attention (H is tiny, static Python unroll is fine;
        #      at production H/ROWS switch to lax.fori_loop(unroll=True)).
        #      N = D = 8 here, so score and P@V run on the VPU in f32 —
        #      TB*H 8x8x8 MXU ops would be latency-bound, not FLOP-bound.
        for h in range(H):
            q3 = qkv[:, h * D:(h + 1) * D].reshape(TB, N, D)            # f32
            k3 = qkv[:, HD + h * D:HD + (h + 1) * D].reshape(TB, N, D)
            v3 = qkv[:, 2 * HD + h * D:2 * HD + (h + 1) * D].reshape(TB, N, D)

            # scores: s[b,i,j] = sum_d q[b,i,d] * k[b,j,d]   (VPU mul + reduce)
            s = jnp.sum(q3[:, :, None, :] * k3[:, None, :, :], axis=-1)  # (TB,N,N)

            # softmax in f32; divide goes to the EUP via approx reciprocal
            # (~1e-4 rel. error — acceptable for inference, tolerance-covered).
            m = jnp.max(s, axis=-1, keepdims=True)
            e = jnp.exp(s - m)
            denom = jnp.sum(e, axis=-1, keepdims=True)
            p = e * pl.reciprocal(denom, approx=True)                    # (TB,N,N)

            # out[b,i,d] = sum_j p[b,i,j] * v[b,j,d]          (VPU mul + reduce)
            hout = jnp.sum(p[:, :, :, None] * v3[:, None, :, :], axis=2)  # (TB,N,D)

            # head output lands at a static lane offset in the concat scratch.
            cat_ref[:, h * D:(h + 1) * D] = (
                hout.reshape(ROWS, D).astype(jnp.bfloat16))

        # ---- multi-head combine as ONE (ROWS,HD)@(HD,E) matmul + residual ----
        out1 = x + bc_ref[...] + jnp.dot(cat_ref[...], wc_ref[...],
                                         preferred_element_type=jnp.float32)

        # ---- feed forward: W2(relu(W1(out1))) + residual ----
        h1 = jnp.dot(out1.astype(jnp.bfloat16), w1_ref[...],
                     preferred_element_type=jnp.float32) + b1_ref[...]   # (ROWS,F)
        h1 = jnp.maximum(h1, 0.0).astype(jnp.bfloat16)
        ff = jnp.dot(h1, w2_ref[...],
                     preferred_element_type=jnp.float32) + b2_ref[...]   # (ROWS,E)

        o_ref[...] = (out1 + ff).astype(o_ref.dtype)

    return kernel


# ----------------------------------------------------------------------------
# Wrapper
# ----------------------------------------------------------------------------
def prep_kernel_params(p, head_num, qkv_dim):
    """Canonical (in, out) f32 params -> kernel layout: fused bf16 QKV slab
       (attention scale folded into the Wq third), bf16 matmul weights,
       f32 biases and f32 embedding weight (used on the VPU)."""
    E = p["we"].shape[1]
    F = p["w1"].shape[1]
    scale = 1.0 / math.sqrt(float(qkv_dim))

    wqkv = jnp.concatenate([p["wq"] * scale, p["wk"], p["wv"]], axis=1)  # (E, 3HD)

    bf = lambda t: t.astype(jnp.bfloat16)
    return dict(
        we=p["we"],                          # (2, E) f32 — VPU embedding
        be=p["be"].reshape(1, E),
        wqkv=bf(wqkv),                       # (E, 3*HD) bf16
        wc=bf(p["wc"]),                      # (HD, E) bf16
        bc=p["bc"].reshape(1, E),
        w1=bf(p["w1"]), b1=p["b1"].reshape(1, F),
        w2=bf(p["w2"]), b2=p["b2"].reshape(1, E),
    )


def tsp_encoder_forward(data, params, *, head_num, qkv_dim, rows_per_tile=2048):
    """data: (B, N, 2) float32.  params: canonical f32 params (see init_params)."""
    B, N, two = data.shape
    assert two == 2
    E = params["we"].shape[1]
    F = params["w1"].shape[1]
    H, D = head_num, qkv_dim
    HD = H * D

    # --- batch-tile selection: decouple tile size from divisibility ---------
    tb = max(1, min(B, rows_per_tile // max(N, 1)))
    if B >= 2:
        tb = min(tb, (B + 1) // 2)        # guarantee >= 2 grid steps (v7x: 2 TCs)
    # keep the row-block sublane (8) aligned when the grid has > 1 step
    while tb < B and (tb * N) % 8 != 0:
        tb += 1
    grid = pl.cdiv(B, tb)
    b_pad = grid * tb
    rows = tb * N

    # Pad with whole fake batch elements (attention never crosses elements,
    # so padded rows are benign); slice the real rows back out afterwards.
    data2 = data.reshape(B * N, 2)
    pad_rows = (b_pad - B) * N
    if pad_rows:
        data2 = jnp.pad(data2, ((0, pad_rows), (0, 0)))

    kp = prep_kernel_params(params, head_num, qkv_dim)
    kernel = make_tsp_encoder_kernel(H, D, N, tb)

    def const2(shape):
        return pl.BlockSpec(shape, lambda i: (0, 0))

    out2 = pl.pallas_call(
        kernel,
        out_shape=jax.ShapeDtypeStruct((b_pad * N, E), jnp.float32),
        grid_spec=pltpu.PrefetchScalarGridSpec(
            num_scalar_prefetch=0,
            grid=(grid,),
            in_specs=[
                pl.BlockSpec((rows, 2), lambda i: (i, 0)),   # node coords tile
                const2((2, E)), const2((1, E)),              # embedding W (f32), b
                const2((E, 3 * HD)),                         # fused Wq|Wk|Wv
                const2((HD, E)), const2((1, E)),             # combine W, b
                const2((E, F)), const2((1, F)),              # FF W1, b1
                const2((F, E)), const2((1, E)),              # FF W2, b2
            ],
            out_specs=pl.BlockSpec((rows, E), lambda i: (i, 0)),
            scratch_shapes=[pltpu.VMEM((rows, HD), jnp.bfloat16)],  # head concat
        ),
        compiler_params=pltpu.CompilerParams(
            dimension_semantics=("parallel",),
            vmem_limit_bytes=32 * 1024 * 1024),
    )(data2, kp["we"], kp["be"], kp["wqkv"], kp["wc"], kp["bc"],
      kp["w1"], kp["b1"], kp["w2"], kp["b2"])

    return out2[: B * N].reshape(B, N, E)


# ----------------------------------------------------------------------------
# Parameters + pure-JAX reference (mirrors the PyTorch module, f32)
# ----------------------------------------------------------------------------
def init_params(key, embedding_dim, head_num, qkv_dim, ff_hidden_dim):
    """Canonical f32 params.  Weights generated in PyTorch (out, in) convention
       then transposed to (in, out)."""
    E, HD, F = embedding_dim, head_num * qkv_dim, ff_hidden_dim
    ks = jax.random.split(key, 11)

    def lin_w(k, out_f, in_f):
        bound = 1.0 / math.sqrt(in_f)
        return jax.random.uniform(k, (out_f, in_f), jnp.float32, -bound, bound).T

    def lin_b(k, out_f, in_f):
        bound = 1.0 / math.sqrt(in_f)
        return jax.random.uniform(k, (out_f,), jnp.float32, -bound, bound)

    return dict(
        we=lin_w(ks[0], E, 2), be=lin_b(ks[1], E, 2),
        wq=lin_w(ks[2], HD, E),
        wk=lin_w(ks[3], HD, E),
        wv=lin_w(ks[4], HD, E),
        wc=lin_w(ks[5], E, HD), bc=lin_b(ks[6], E, HD),
        w1=lin_w(ks[7], F, E), b1=lin_b(ks[8], F, E),
        w2=lin_w(ks[9], E, F), b2=lin_b(ks[10], E, F),
    )


def reference_forward(data, p, *, head_num, qkv_dim):
    B, N, _ = data.shape
    x = data @ p["we"] + p["be"]                     # embedding
    q = x @ p["wq"]
    k = x @ p["wk"]
    v = x @ p["wv"]

    def heads(t):                                    # (B, N, H*D) -> (B, H, N, D)
        return t.reshape(B, N, head_num, qkv_dim).transpose(0, 2, 1, 3)

    qh, kh, vh = heads(q), heads(k), heads(v)
    score = jnp.einsum("bhnd,bhmd->bhnm", qh, kh) / jnp.sqrt(jnp.float32(qkv_dim))
    w = jax.nn.softmax(score, axis=-1)
    out = jnp.einsum("bhnm,bhmd->bhnd", w, vh)
    out_concat = out.transpose(0, 2, 1, 3).reshape(B, N, head_num * qkv_dim)
    mh = out_concat @ p["wc"] + p["bc"]
    out1 = x + mh
    ff = jnp.maximum(out1 @ p["w1"] + p["b1"], 0.0) @ p["w2"] + p["b2"]
    return out1 + ff


# ----------------------------------------------------------------------------
if __name__ == "__main__":
    batch = 2
    n = 8
    embedding_dim = 32
    head_num = 4
    qkv_dim = 8            # head_num * qkv_dim == embedding_dim (as in LEHD)
    ff_hidden_dim = 64

    key = jax.random.PRNGKey(0)
    kd, kp = jax.random.split(key)
    data = jax.random.uniform(kd, (batch, n, 2), jnp.float32)   # TSP node coords
    params = init_params(kp, embedding_dim, head_num, qkv_dim, ff_hidden_dim)

    out = tsp_encoder_forward(data, params, head_num=head_num, qkv_dim=qkv_dim)
    out = jax.block_until_ready(out)

    ref = reference_forward(data, params, head_num=head_num, qkv_dim=qkv_dim)
    assert out.shape == (batch, n, embedding_dim)
    # Matmuls run with bf16 operands (f32 accumulation) -> loose-but-bug-catching tol.
    assert jnp.allclose(out, ref, atol=5e-2, rtol=5e-2), \
        float(jnp.max(jnp.abs(out - ref)))

    print("KERNEL_OK")
</pallas_src>

<mosaic_0001>
module attributes {stable_mosaic.version = 11 : i64} {
  func.func @kernel(%arg0: i32, %arg1: memref<8x2xf32, #tpu.memory_space<vmem>>, %arg2: memref<2x32xf32, #tpu.memory_space<vmem>>, %arg3: memref<1x32xf32, #tpu.memory_space<vmem>>, %arg4: memref<32x96xbf16, #tpu.memory_space<vmem>>, %arg5: memref<32x32xbf16, #tpu.memory_space<vmem>>, %arg6: memref<1x32xf32, #tpu.memory_space<vmem>>, %arg7: memref<32x64xbf16, #tpu.memory_space<vmem>>, %arg8: memref<1x64xf32, #tpu.memory_space<vmem>>, %arg9: memref<64x32xbf16, #tpu.memory_space<vmem>>, %arg10: memref<1x32xf32, #tpu.memory_space<vmem>>, %arg11: memref<8x32xf32, #tpu.memory_space<vmem>>, %arg12: memref<8x32xbf16, #tpu.memory_space<vmem>>) attributes {dimension_semantics = [#tpu.dimension_semantics<parallel>], iteration_bounds = array<i64: 2>, scalar_prefetch = 0 : i64, scratch_operands = 1 : i64, tpu.core_type = #tpu.core_type<tc>, window_params = [{transform_indices = @transform_0, window_bounds = array<i64: 8, 2>}, {pipeline_mode = #tpu.pipeline_mode<synchronous>, transform_indices = @transform_1, window_bounds = array<i64: 2, 32>}, {pipeline_mode = #tpu.pipeline_mode<synchronous>, transform_indices = @transform_2, window_bounds = array<i64: 1, 32>}, {pipeline_mode = #tpu.pipeline_mode<synchronous>, transform_indices = @transform_3, window_bounds = array<i64: 32, 96>}, {pipeline_mode = #tpu.pipeline_mode<synchronous>, transform_indices = @transform_4, window_bounds = array<i64: 32, 32>}, {pipeline_mode = #tpu.pipeline_mode<synchronous>, transform_indices = @transform_5, window_bounds = array<i64: 1, 32>}, {pipeline_mode = #tpu.pipeline_mode<synchronous>, transform_indices = @transform_6, window_bounds = array<i64: 32, 64>}, {pipeline_mode = #tpu.pipeline_mode<synchronous>, transform_indices = @transform_7, window_bounds = array<i64: 1, 64>}, {pipeline_mode = #tpu.pipeline_mode<synchronous>, transform_indices = @transform_8, window_bounds = array<i64: 64, 32>}, {pipeline_mode = #tpu.pipeline_mode<synchronous>, transform_indices = @transform_9, window_bounds = array<i64: 1, 32>}, {transform_indices = @transform_10, window_bounds = array<i64: 8, 32>}]} {
    %c0 = arith.constant 0 : index
    %c0_0 = arith.constant 0 : index
    %0 = vector.load %arg1[%c0, %c0_0] : memref<8x2xf32, #tpu.memory_space<vmem>>, vector<8x2xf32>
    %1 = vector.extract_strided_slice %0 {offsets = [0, 0], sizes = [8, 1], strides = [1, 1]} : vector<8x2xf32> to vector<8x1xf32>
    %c0_1 = arith.constant 0 : index
    %c0_2 = arith.constant 0 : index
    %2 = vector.load %arg2[%c0_1, %c0_2] : memref<2x32xf32, #tpu.memory_space<vmem>>, vector<1x32xf32>
    %3 = vector.broadcast %1 : vector<8x1xf32> to vector<8x32xf32>
    %4 = vector.broadcast %2 : vector<1x32xf32> to vector<8x32xf32>
    %5 = arith.mulf %3, %4 : vector<8x32xf32>
    %6 = vector.extract_strided_slice %0 {offsets = [0, 1], sizes = [8, 1], strides = [1, 1]} : vector<8x2xf32> to vector<8x1xf32>
    %c1 = arith.constant 1 : index
    %c0_3 = arith.constant 0 : index
    %7 = vector.load %arg2[%c1, %c0_3] : memref<2x32xf32, #tpu.memory_space<vmem>>, vector<1x32xf32>
    %8 = vector.broadcast %6 : vector<8x1xf32> to vector<8x32xf32>
    %9 = vector.broadcast %7 : vector<1x32xf32> to vector<8x32xf32>
    %10 = arith.mulf %8, %9 : vector<8x32xf32>
    %11 = arith.addf %5, %10 : vector<8x32xf32>
    %c0_4 = arith.constant 0 : index
    %c0_5 = arith.constant 0 : index
    %12 = vector.load %arg3[%c0_4, %c0_5] : memref<1x32xf32, #tpu.memory_space<vmem>>, vector<1x32xf32>
    %13 = vector.broadcast %12 : vector<1x32xf32> to vector<8x32xf32>
    %14 = arith.addf %11, %13 : vector<8x32xf32>
    %15 = arith.truncf %14 : vector<8x32xf32> to vector<8x32xbf16>
    %c0_6 = arith.constant 0 : index
    %c0_7 = arith.constant 0 : index
    %16 = vector.load %arg4[%c0_6, %c0_7] : memref<32x96xbf16, #tpu.memory_space<vmem>>, vector<32x96xbf16>
    %cst = arith.constant dense<0.000000e+00> : vector<8x96xf32>
    %17 = tpu.matmul %15, %16, %cst {dimension_numbers = #tpu.dot_dimension_numbers<[1], [0], [0], [1], [0, 0, 1, 1], [], []>} : vector<8x32xbf16>, vector<32x96xbf16>, vector<8x96xf32> -> vector<8x96xf32>
    %18 = vector.extract_strided_slice %17 {offsets = [0, 0], sizes = [8, 8], strides = [1, 1]} : vector<8x96xf32> to vector<8x8xf32>
    %19 = vector.shape_cast %18 : vector<8x8xf32> to vector<1x8x8xf32>
    %20 = vector.extract_strided_slice %17 {offsets = [0, 32], sizes = [8, 8], strides = [1, 1]} : vector<8x96xf32> to vector<8x8xf32>
    %21 = vector.shape_cast %20 : vector<8x8xf32> to vector<1x8x8xf32>
    %22 = vector.extract_strided_slice %17 {offsets = [0, 64], sizes = [8, 8], strides = [1, 1]} : vector<8x96xf32> to vector<8x8xf32>
    %23 = vector.shape_cast %22 : vector<8x8xf32> to vector<1x8x8xf32>
    %24 = vector.shape_cast %19 : vector<1x8x8xf32> to vector<1x8x1x8xf32>
    %25 = vector.shape_cast %21 : vector<1x8x8xf32> to vector<1x1x8x8xf32>
    %26 = vector.broadcast %24 : vector<1x8x1x8xf32> to vector<1x8x8x8xf32>
    %27 = vector.broadcast %25 : vector<1x1x8x8xf32> to vector<1x8x8x8xf32>
    %28 = arith.mulf %26, %27 : vector<1x8x8x8xf32>
    %cst_8 = arith.constant dense<0.000000e+00> : vector<1x8x8xf32>
    %29 = vector.multi_reduction <add>, %28, %cst_8 [3] : vector<1x8x8x8xf32> to vector<1x8x8xf32>
    %cst_9 = arith.constant dense<0xFF800000> : vector<1x8xf32>
    %30 = vector.multi_reduction <maximumf>, %29, %cst_9 [2] : vector<1x8x8xf32> to vector<1x8xf32>
    %31 = vector.shape_cast %30 : vector<1x8xf32> to vector<1x8x1xf32>
    %32 = vector.broadcast %31 : vector<1x8x1xf32> to vector<1x8x8xf32>
    %33 = arith.subf %29, %32 : vector<1x8x8xf32>
    %34 = math.exp %33 : vector<1x8x8xf32>
    %cst_10 = arith.constant dense<0.000000e+00> : vector<1x8xf32>
    %35 = vector.multi_reduction <add>, %34, %cst_10 [2] : vector<1x8x8xf32> to vector<1x8xf32>
    %36 = vector.shape_cast %35 : vector<1x8xf32> to vector<1x8x1xf32>
    %37 = tpu.reciprocal %36 {approx = true} : vector<1x8x1xf32> -> vector<1x8x1xf32>
    %38 = vector.broadcast %37 : vector<1x8x1xf32> to vector<1x8x8xf32>
    %39 = arith.mulf %34, %38 : vector<1x8x8xf32>
    %40 = vector.shape_cast %39 : vector<1x8x8xf32> to vector<1x8x8x1xf32>
    %41 = vector.shape_cast %23 : vector<1x8x8xf32> to vector<1x1x8x8xf32>
    %42 = vector.broadcast %40 : vector<1x8x8x1xf32> to vector<1x8x8x8xf32>
    %43 = vector.broadcast %41 : vector<1x1x8x8xf32> to vector<1x8x8x8xf32>
    %44 = arith.mulf %42, %43 : vector<1x8x8x8xf32>
    %cst_11 = arith.constant dense<0.000000e+00> : vector<1x8x8xf32>
    %45 = vector.multi_reduction <add>, %44, %cst_11 [2] : vector<1x8x8x8xf32> to vector<1x8x8xf32>
    %46 = vector.shape_cast %45 : vector<1x8x8xf32> to vector<8x8xf32>
    %47 = arith.truncf %46 : vector<8x8xf32> to vector<8x8xbf16>
    %c0_12 = arith.constant 0 : index
    %c0_13 = arith.constant 0 : index
    %48 = vector.load %arg12[%c0_12, %c0_13] : memref<8x32xbf16, #tpu.memory_space<vmem>>, vector<8x8xbf16>
    tpu.vector_store %arg12[%c0_12, %c0_13], %47 {strides = array<i32>} : memref<8x32xbf16, #tpu.memory_space<vmem>>, vector<8x8xbf16>,
    %49 = vector.extract_strided_slice %17 {offsets = [0, 8], sizes = [8, 8], strides = [1, 1]} : vector<8x96xf32> to vector<8x8xf32>
    %50 = vector.shape_cast %49 : vector<8x8xf32> to vector<1x8x8xf32>
    %51 = vector.extract_strided_slice %17 {offsets = [0, 40], sizes = [8, 8], strides = [1, 1]} : vector<8x96xf32> to vector<8x8xf32>
    %52 = vector.shape_cast %51 : vector<8x8xf32> to vector<1x8x8xf32>
    %53 = vector.extract_strided_slice %17 {offsets = [0, 72], sizes = [8, 8], strides = [1, 1]} : vector<8x96xf32> to vector<8x8xf32>
    %54 = vector.shape_cast %53 : vector<8x8xf32> to vector<1x8x8xf32>
    %55 = vector.shape_cast %50 : vector<1x8x8xf32> to vector<1x8x1x8xf32>
    %56 = vector.shape_cast %52 : vector<1x8x8xf32> to vector<1x1x8x8xf32>
    %57 = vector.broadcast %55 : vector<1x8x1x8xf32> to vector<1x8x8x8xf32>
    %58 = vector.broadcast %56 : vector<1x1x8x8xf32> to vector<1x8x8x8xf32>
    %59 = arith.mulf %57, %58 : vector<1x8x8x8xf32>
    %cst_14 = arith.constant dense<0.000000e+00> : vector<1x8x8xf32>
    %60 = vector.multi_reduction <add>, %59, %cst_14 [3] : vector<1x8x8x8xf32> to vector<1x8x8xf32>
    %cst_15 = arith.constant dense<0xFF800000> : vector<1x8xf32>
    %61 = vector.multi_reduction <maximumf>, %60, %cst_15 [2] : vector<1x8x8xf32> to vector<1x8xf32>
    %62 = vector.shape_cast %61 : vector<1x8xf32> to vector<1x8x1xf32>
    %63 = vector.broadcast %62 : vector<1x8x1xf32> to vector<1x8x8xf32>
    %64 = arith.subf %60, %63 : vector<1x8x8xf32>
    %65 = math.exp %64 : vector<1x8x8xf32>
    %cst_16 = arith.constant dense<0.000000e+00> : vector<1x8xf32>
    %66 = vector.multi_reduction <add>, %65, %cst_16 [2] : vector<1x8x8xf32> to vector<1x8xf32>
    %67 = vector.shape_cast %66 : vector<1x8xf32> to vector<1x8x1xf32>
    %68 = tpu.reciprocal %67 {approx = true} : vector<1x8x1xf32> -> vector<1x8x1xf32>
    %69 = vector.broadcast %68 : vector<1x8x1xf32> to vector<1x8x8xf32>
    %70 = arith.mulf %65, %69 : vector<1x8x8xf32>
    %71 = vector.shape_cast %70 : vector<1x8x8xf32> to vector<1x8x8x1xf32>
    %72 = vector.shape_cast %54 : vector<1x8x8xf32> to vector<1x1x8x8xf32>
    %73 = vector.broadcast %71 : vector<1x8x8x1xf32> to vector<1x8x8x8xf32>
    %74 = vector.broadcast %72 : vector<1x1x8x8xf32> to vector<1x8x8x8xf32>
    %75 = arith.mulf %73, %74 : vector<1x8x8x8xf32>
    %cst_17 = arith.constant dense<0.000000e+00> : vector<1x8x8xf32>
    %76 = vector.multi_reduction <add>, %75, %cst_17 [2] : vector<1x8x8x8xf32> to vector<1x8x8xf32>
    %77 = vector.shape_cast %76 : vector<1x8x8xf32> to vector<8x8xf32>
    %78 = arith.truncf %77 : vector<8x8xf32> to vector<8x8xbf16>
    %c0_18 = arith.constant 0 : index
    %c8 = arith.constant 8 : index
    %79 = vector.load %arg12[%c0_18, %c8] : memref<8x32xbf16, #tpu.memory_space<vmem>>, vector<8x8xbf16>
    tpu.vector_store %arg12[%c0_18, %c8], %78 {strides = array<i32>} : memref<8x32xbf16, #tpu.memory_space<vmem>>, vector<8x8xbf16>,
    %80 = vector.extract_strided_slice %17 {offsets = [0, 16], sizes = [8, 8], strides = [1, 1]} : vector<8x96xf32> to vector<8x8xf32>
    %81 = vector.shape_cast %80 : vector<8x8xf32> to vector<1x8x8xf32>
    %82 = vector.extract_strided_slice %17 {offsets = [0, 48], sizes = [8, 8], strides = [1, 1]} : vector<8x96xf32> to vector<8x8xf32>
    %83 = vector.shape_cast %82 : vector<8x8xf32> to vector<1x8x8xf32>
    %84 = vector.extract_strided_slice %17 {offsets = [0, 80], sizes = [8, 8], strides = [1, 1]} : vector<8x96xf32> to vector<8x8xf32>
    %85 = vector.shape_cast %84 : vector<8x8xf32> to vector<1x8x8xf32>
    %86 = vector.shape_cast %81 : vector<1x8x8xf32> to vector<1x8x1x8xf32>
    %87 = vector.shape_cast %83 : vector<1x8x8xf32> to vector<1x1x8x8xf32>
    %88 = vector.broadcast %86 : vector<1x8x1x8xf32> to vector<1x8x8x8xf32>
    %89 = vector.broadcast %87 : vector<1x1x8x8xf32> to vector<1x8x8x8xf32>
    %90 = arith.mulf %88, %89 : vector<1x8x8x8xf32>
    %cst_19 = arith.constant dense<0.000000e+00> : vector<1x8x8xf32>
    %91 = vector.multi_reduction <add>, %90, %cst_19 [3] : vector<1x8x8x8xf32> to vector<1x8x8xf32>
    %cst_20 = arith.constant dense<0xFF800000> : vector<1x8xf32>
    %92 = vector.multi_reduction <maximumf>, %91, %cst_20 [2] : vector<1x8x8xf32> to vector<1x8xf32>
    %93 = vector.shape_cast %92 : vector<1x8xf32> to vector<1x8x1xf32>
    %94 = vector.broadcast %93 : vector<1x8x1xf32> to vector<1x8x8xf32>
    %95 = arith.subf %91, %94 : vector<1x8x8xf32>
    %96 = math.exp %95 : vector<1x8x8xf32>
    %cst_21 = arith.constant dense<0.000000e+00> : vector<1x8xf32>
    %97 = vector.multi_reduction <add>, %96, %cst_21 [2] : vector<1x8x8xf32> to vector<1x8xf32>
    %98 = vector.shape_cast %97 : vector<1x8xf32> to vector<1x8x1xf32>
    %99 = tpu.reciprocal %98 {approx = true} : vector<1x8x1xf32> -> vector<1x8x1xf32>
    %100 = vector.broadcast %99 : vector<1x8x1xf32> to vector<1x8x8xf32>
    %101 = arith.mulf %96, %100 : vector<1x8x8xf32>
    %102 = vector.shape_cast %101 : vector<1x8x8xf32> to vector<1x8x8x1xf32>
    %103 = vector.shape_cast %85 : vector<1x8x8xf32> to vector<1x1x8x8xf32>
    %104 = vector.broadcast %102 : vector<1x8x8x1xf32> to vector<1x8x8x8xf32>
    %105 = vector.broadcast %103 : vector<1x1x8x8xf32> to vector<1x8x8x8xf32>
    %106 = arith.mulf %104, %105 : vector<1x8x8x8xf32>
    %cst_22 = arith.constant dense<0.000000e+00> : vector<1x8x8xf32>
    %107 = vector.multi_reduction <add>, %106, %cst_22 [2] : vector<1x8x8x8xf32> to vector<1x8x8xf32>
    %108 = vector.shape_cast %107 : vector<1x8x8xf32> to vector<8x8xf32>
    %109 = arith.truncf %108 : vector<8x8xf32> to vector<8x8xbf16>
    %c0_23 = arith.constant 0 : index
    %c16 = arith.constant 16 : index
    %110 = vector.load %arg12[%c0_23, %c16] : memref<8x32xbf16, #tpu.memory_space<vmem>>, vector<8x8xbf16>
    tpu.vector_store %arg12[%c0_23, %c16], %109 {strides = array<i32>} : memref<8x32xbf16, #tpu.memory_space<vmem>>, vector<8x8xbf16>,
    %111 = vector.extract_strided_slice %17 {offsets = [0, 24], sizes = [8, 8], strides = [1, 1]} : vector<8x96xf32> to vector<8x8xf32>
    %112 = vector.shape_cast %111 : vector<8x8xf32> to vector<1x8x8xf32>
    %113 = vector.extract_strided_slice %17 {offsets = [0, 56], sizes = [8, 8], strides = [1, 1]} : vector<8x96xf32> to vector<8x8xf32>
    %114 = vector.shape_cast %113 : vector<8x8xf32> to vector<1x8x8xf32>
    %115 = vector.extract_strided_slice %17 {offsets = [0, 88], sizes = [8, 8], strides = [1, 1]} : vector<8x96xf32> to vector<8x8xf32>
    %116 = vector.shape_cast %115 : vector<8x8xf32> to vector<1x8x8xf32>
    %117 = vector.shape_cast %112 : vector<1x8x8xf32> to vector<1x8x1x8xf32>
    %118 = vector.shape_cast %114 : vector<1x8x8xf32> to vector<1x1x8x8xf32>
    %119 = vector.broadcast %117 : vector<1x8x1x8xf32> to vector<1x8x8x8xf32>
    %120 = vector.broadcast %118 : vector<1x1x8x8xf32> to vector<1x8x8x8xf32>
    %121 = arith.mulf %119, %120 : vector<1x8x8x8xf32>
    %cst_24 = arith.constant dense<0.000000e+00> : vector<1x8x8xf32>
    %122 = vector.multi_reduction <add>, %121, %cst_24 [3] : vector<1x8x8x8xf32> to vector<1x8x8xf32>
    %cst_25 = arith.constant dense<0xFF800000> : vector<1x8xf32>
    %123 = vector.multi_reduction <maximumf>, %122, %cst_25 [2] : vector<1x8x8xf32> to vector<1x8xf32>
    %124 = vector.shape_cast %123 : vector<1x8xf32> to vector<1x8x1xf32>
    %125 = vector.broadcast %124 : vector<1x8x1xf32> to vector<1x8x8xf32>
    %126 = arith.subf %122, %125 : vector<1x8x8xf32>
    %127 = math.exp %126 : vector<1x8x8xf32>
    %cst_26 = arith.constant dense<0.000000e+00> : vector<1x8xf32>
    %128 = vector.multi_reduction <add>, %127, %cst_26 [2] : vector<1x8x8xf32> to vector<1x8xf32>
    %129 = vector.shape_cast %128 : vector<1x8xf32> to vector<1x8x1xf32>
    %130 = tpu.reciprocal %129 {approx = true} : vector<1x8x1xf32> -> vector<1x8x1xf32>
    %131 = vector.broadcast %130 : vector<1x8x1xf32> to vector<1x8x8xf32>
    %132 = arith.mulf %127, %131 : vector<1x8x8xf32>
    %133 = vector.shape_cast %132 : vector<1x8x8xf32> to vector<1x8x8x1xf32>
    %134 = vector.shape_cast %116 : vector<1x8x8xf32> to vector<1x1x8x8xf32>
    %135 = vector.broadcast %133 : vector<1x8x8x1xf32> to vector<1x8x8x8xf32>
    %136 = vector.broadcast %134 : vector<1x1x8x8xf32> to vector<1x8x8x8xf32>
    %137 = arith.mulf %135, %136 : vector<1x8x8x8xf32>
    %cst_27 = arith.constant dense<0.000000e+00> : vector<1x8x8xf32>
    %138 = vector.multi_reduction <add>, %137, %cst_27 [2] : vector<1x8x8x8xf32> to vector<1x8x8xf32>
    %139 = vector.shape_cast %138 : vector<1x8x8xf32> to vector<8x8xf32>
    %140 = arith.truncf %139 : vector<8x8xf32> to vector<8x8xbf16>
    %c0_28 = arith.constant 0 : index
    %c24 = arith.constant 24 : index
    %141 = vector.load %arg12[%c0_28, %c24] : memref<8x32xbf16, #tpu.memory_space<vmem>>, vector<8x8xbf16>
    tpu.vector_store %arg12[%c0_28, %c24], %140 {strides = array<i32>} : memref<8x32xbf16, #tpu.memory_space<vmem>>, vector<8x8xbf16>,
    %c0_29 = arith.constant 0 : index
    %c0_30 = arith.constant 0 : index
    %142 = vector.load %arg6[%c0_29, %c0_30] : memref<1x32xf32, #tpu.memory_space<vmem>>, vector<1x32xf32>
    %143 = vector.broadcast %142 : vector<1x32xf32> to vector<8x32xf32>
    %144 = arith.addf %14, %143 : vector<8x32xf32>
    %c0_31 = arith.constant 0 : index
    %c0_32 = arith.constant 0 : index
    %145 = vector.load %arg12[%c0_31, %c0_32] : memref<8x32xbf16, #tpu.memory_space<vmem>>, vector<8x32xbf16>
    %c0_33 = arith.constant 0 : index
    %c0_34 = arith.constant 0 : index
    %146 = vector.load %arg5[%c0_33, %c0_34] : memref<32x32xbf16, #tpu.memory_space<vmem>>, vector<32x32xbf16>
    %cst_35 = arith.constant dense<0.000000e+00> : vector<8x32xf32>
    %147 = tpu.matmul %145, %146, %cst_35 {dimension_numbers = #tpu.dot_dimension_numbers<[1], [0], [0], [1], [0, 0, 1, 1], [], []>} : vector<8x32xbf16>, vector<32x32xbf16>, vector<8x32xf32> -> vector<8x32xf32>
    %148 = arith.addf %144, %147 : vector<8x32xf32>
    %149 = arith.truncf %148 : vector<8x32xf32> to vector<8x32xbf16>
    %c0_36 = arith.constant 0 : index
    %c0_37 = arith.constant 0 : index
    %150 = vector.load %arg7[%c0_36, %c0_37] : memref<32x64xbf16, #tpu.memory_space<vmem>>, vector<32x64xbf16>
    %cst_38 = arith.constant dense<0.000000e+00> : vector<8x64xf32>
    %151 = tpu.matmul %149, %150, %cst_38 {dimension_numbers = #tpu.dot_dimension_numbers<[1], [0], [0], [1], [0, 0, 1, 1], [], []>} : vector<8x32xbf16>, vector<32x64xbf16>, vector<8x64xf32> -> vector<8x64xf32>
    %c0_39 = arith.constant 0 : index
    %c0_40 = arith.constant 0 : index
    %152 = vector.load %arg8[%c0_39, %c0_40] : memref<1x64xf32, #tpu.memory_space<vmem>>, vector<1x64xf32>
    %153 = vector.broadcast %152 : vector<1x64xf32> to vector<8x64xf32>
    %154 = arith.addf %151, %153 : vector<8x64xf32>
    %cst_41 = arith.constant 0.000000e+00 : f32
    %155 = vector.broadcast %cst_41 : f32 to vector<8x64xf32>
    %156 = arith.maximumf %154, %155 : vector<8x64xf32>
    %157 = arith.truncf %156 : vector<8x64xf32> to vector<8x64xbf16>
    %c0_42 = arith.constant 0 : index
    %c0_43 = arith.constant 0 : index
    %158 = vector.load %arg9[%c0_42, %c0_43] : memref<64x32xbf16, #tpu.memory_space<vmem>>, vector<64x32xbf16>
    %cst_44 = arith.constant dense<0.000000e+00> : vector<8x32xf32>
    %159 = tpu.matmul %157, %158, %cst_44 {dimension_numbers = #tpu.dot_dimension_numbers<[1], [0], [0], [1], [0, 0, 1, 1], [], []>} : vector<8x64xbf16>, vector<64x32xbf16>, vector<8x32xf32> -> vector<8x32xf32>
    %c0_45 = arith.constant 0 : index
    %c0_46 = arith.constant 0 : index
    %160 = vector.load %arg10[%c0_45, %c0_46] : memref<1x32xf32, #tpu.memory_space<vmem>>, vector<1x32xf32>
    %161 = vector.broadcast %160 : vector<1x32xf32> to vector<8x32xf32>
    %162 = arith.addf %159, %161 : vector<8x32xf32>
    %163 = arith.addf %148, %162 : vector<8x32xf32>
    %c0_47 = arith.constant 0 : index
    %c0_48 = arith.constant 0 : index
    %164 = vector.load %arg11[%c0_47, %c0_48] : memref<8x32xf32, #tpu.memory_space<vmem>>, vector<8x32xf32>
    tpu.vector_store %arg11[%c0_47, %c0_48], %163 {strides = array<i32>} : memref<8x32xf32, #tpu.memory_space<vmem>>, vector<8x32xf32>,
    return
  }
  func.func @transform_0(%arg0: i32) -> (i32, i32) {
    %c0_i32 = arith.constant 0 : i32
    %c0_i32_0 = arith.constant 0 : i32
    return %arg0, %c0_i32 : i32, i32
  }
  func.func @transform_1(%arg0: i32) -> (i32, i32) {
    %c0_i32 = arith.constant 0 : i32
    %c0_i32_0 = arith.constant 0 : i32
    %c0_i32_1 = arith.constant 0 : i32
    return %c0_i32, %c0_i32_0 : i32, i32
  }
  func.func @transform_2(%arg0: i32) -> (i32, i32) {
    %c0_i32 = arith.constant 0 : i32
    %c0_i32_0 = arith.constant 0 : i32
    %c0_i32_1 = arith.constant 0 : i32
    return %c0_i32, %c0_i32_0 : i32, i32
  }
  func.func @transform_3(%arg0: i32) -> (i32, i32) {
    %c0_i32 = arith.constant 0 : i32
    %c0_i32_0 = arith.constant 0 : i32
    %c0_i32_1 = arith.constant 0 : i32
    return %c0_i32, %c0_i32_0 : i32, i32
  }
  func.func @transform_4(%arg0: i32) -> (i32, i32) {
    %c0_i32 = arith.constant 0 : i32
    %c0_i32_0 = arith.constant 0 : i32
    %c0_i32_1 = arith.constant 0 : i32
    return %c0_i32, %c0_i32_0 : i32, i32
  }
  func.func @transform_5(%arg0: i32) -> (i32, i32) {
    %c0_i32 = arith.constant 0 : i32
    %c0_i32_0 = arith.constant 0 : i32
    %c0_i32_1 = arith.constant 0 : i32
    return %c0_i32, %c0_i32_0 : i32, i32
  }
  func.func @transform_6(%arg0: i32) -> (i32, i32) {
    %c0_i32 = arith.constant 0 : i32
    %c0_i32_0 = arith.constant 0 : i32
    %c0_i32_1 = arith.constant 0 : i32
    return %c0_i32, %c0_i32_0 : i32, i32
  }
  func.func @transform_7(%arg0: i32) -> (i32, i32) {
    %c0_i32 = arith.constant 0 : i32
    %c0_i32_0 = arith.constant 0 : i32
    %c0_i32_1 = arith.constant 0 : i32
    return %c0_i32, %c0_i32_0 : i32, i32
  }
  func.func @transform_8(%arg0: i32) -> (i32, i32) {
    %c0_i32 = arith.constant 0 : i32
    %c0_i32_0 = arith.constant 0 : i32
    %c0_i32_1 = arith.constant 0 : i32
    return %c0_i32, %c0_i32_0 : i32, i32
  }
  func.func @transform_9(%arg0: i32) -> (i32, i32) {
    %c0_i32 = arith.constant 0 : i32
    %c0_i32_0 = arith.constant 0 : i32
    %c0_i32_1 = arith.constant 0 : i32
    return %c0_i32, %c0_i32_0 : i32, i32
  }
  func.func @transform_10(%arg0: i32) -> (i32, i32) {
    %c0_i32 = arith.constant 0 : i32
    %c0_i32_0 = arith.constant 0 : i32
    return %arg0, %c0_i32 : i32, i32
  }
}

</mosaic_0001>

<bundles_post_ra>
// kernel: tpu_custom_call.1
= control target key start
LH: loop header
LB: loop body
LE: loop exit
PB: predicated region body
PF: predicated region fallthrough
CT: control target
= control target key end

     0   :  { %15 = vsyncpa [#allocation4], 0  ;;  %s3931_s0 = inlined_call_operand.vmem [shape: f32[16,2], index: 0, kind: input, shape index: {}]   ;;  %s3932_s1 = inlined_call_operand.vmem [shape: f32[2,32], index: 1, kind: input, shape index: {}]   ;;  %s3933_s2 = inlined_call_operand.vmem [shape: f32[1,32], index: 2, kind: input, shape index: {}]   ;;  %s3934_s3 = inlined_call_operand.vmem [shape: bf16[32,96], index: 3, kind: input, shape index: {}]   ;;  %s3935_s4 = inlined_call_operand.vmem [shape: bf16[32,32], index: 4, kind: input, shape index: {}]   ;;  %s3936_s5 = inlined_call_operand.vmem [shape: f32[1,32], index: 5, kind: input, shape index: {}]   ;;  %s3937_s6 = inlined_call_operand.vmem [shape: bf16[32,64], index: 6, kind: input, shape index: {}]   ;;  %s3938_s7 = inlined_call_operand.vmem [shape: f32[1,64], index: 7, kind: input, shape index: {}]   ;;  %s3939_s8 = inlined_call_operand.vmem [shape: bf16[64,32], index: 8, kind: input, shape index: {}]   ;;  %s3940_s9 = inlined_call_operand.vmem [shape: f32[1,32], index: 9, kind: input, shape index: {}]   ;;  %s3941_s10 = inlined_call_operand.hbm [shape: f32[16,32], index: 10, kind: output, shape index: {}]  }
   0x1   :  { %17 = vsyncpa [#allocation4 + $0x1], 0  ;;  %s3036_s13 = smov 0   ;;  %s3038_s14 = smov 0  }
   0x2   :  { %s3040_s15 = smov 0   ;;  %s3042_s16 = smov 0  }
   0x3 LB: > { %s3057_s17 = sadd.s32 4294967295, %s2968_s16   ;;  %s2627_s18 = sadd.s32 4294967294, %s2968_s16   ;;  %s2968_s16 = sphi %s3042_s16, %s3968_s16   ;;  %s2964_s15 = sphi %s3040_s15, %s3967_s15   ;;  %s2960_s14 = sphi %s3038_s14, %s3966_s14   ;;  %s2956_s13 = sphi %s3036_s13, %s3965_s13  }
   0x4   : > { %s3061_s19 = sadd.s32 1, %s2968_s16   ;;  %s245_s20 = sadd.s32 1, %s2964_s15 }
   0x5   : > { %s242_s21 = ssub.s32 %s2968_s16, %s3061_s19  ;;  %p255_p0 = scmp.ne.s32.totalorder %s2964_s15, %s2960_s14 }
   0x6   : > { %p243_p1 = scmp.eq.s32.totalorder %s242_s21, 0  ;;  %p256_p2 = scmp.eq.s32.totalorder %s3057_s17, 1 }
   0x7   : > { %p261_p3 = scmp.ne.s32.totalorder %s2960_s14, %s2956_s13  ;;  %p262_p4 = scmp.eq.s32.totalorder %s2627_s18, 1 }
   0x8   : > { %s3072_s22 = scalar_select %p243_p1, %s2964_s15, %s245_s20  }
   0x9   : > { %p3074_p5 = por %p256_p2, %p255_p0  ;;  %p3078_p6 = por %p262_p4, %p261_p3 }
   0xa   : > { %p2630_p7 = scmp.ge.s32.totalorder %s2968_s16, 1  ;;  %p314_p8 = scmp.lt.s32.totalorder %s2968_s16, 3 }
   0xc   : > { %p315_p9 = pnand %p2630_p7, %p314_p8 }
   0xe   : > { %318 = sbr.rel (%p315_p9) target bundleno = 2284 (0x8ec), region = 60 }
  0x15   : > { %p351_p10 = scmp.lt.s32.totalorder %s3057_s17, 1  ;;  %v2970_v0 = vmov 0   ;;  %v2971_v2 = vmov 1   ;;  %v2824_v3 = vld [vmem:[%s3934_s3] sm:$0xff]   ;;  %v3942_v4 = vmov 0.0   ;;  %v2825_v5 = vld [vmem:[%s3934_s3 + $0x8] sm:$0xff]   ;;  %v453_v22 = vlaneseq }
  0x16   : > { %2820 = vset.pattern.permute.xlu0 %v2970_v0  ;;  %2822 = vset.pattern.permute.xlu1 %v2970_v0  ;;  %vm2973_vm0 = vmmov 0   ;;  %v2633_v7 = vld [vmem:[%s3932_s1] ss:$0 sm:$0xff]  ;;  %v2634_v8 = vld [vmem:[%s3932_s1 + $0x1] ss:$0 sm:$0xff]  ;;  %vm404_vm1 = vcmask 261120  }
  0x17   : > { %s352_s25 = scalar_select %p351_p10, %s3057_s17, 1  ;;  %2735 = vmatprep.subr.bf16.mxu0 %v3942_v4  ;;  %2743 = vmatprep.subr.bf16.mxu1 %v3942_v4  ;;  %v2635_v12 = vld [vmem:[%s3933_s2] ss:$0 sm:$0xff]  ;;  %v2975_v20 = vmov 1966171168   ;;  %v3123_v24 = vshrl.u32 %v453_v22, 7 }
  0x18   : > { %2736 = vmatpush3.bf16.msra.mxu0 %v2824_v3  ;;  %2739 = vmatprep.mubr.msk.bf16.mxu0 %vm2973_vm0, %v3942_v4  ;;  %v451_v21 = vunpack.c.l.s4 %v2975_v20  ;;  %s2976_s30 = smov 120   ;;  %s2977_s11 = smov 112   ;;  %vm549_vm2 = vcmask 64512   ;;  %vm616_vm3 = vcmask 1041409   ;;  %vm618_vm4 = vcmask 1042434  }
  0x19   : > { %s2632_s26 = sshll.u32 %s352_s25, 3  ;;  %2737 = vmatprep.subr.bf16.mxu0 %v3942_v4  ;;  %2747 = vmatprep.mubr.msk.bf16.mxu1 %vm2973_vm0, %v3942_v4  ;;  %v3128_v28 = vsub.s32 0, %v3123_v24  ;;  %s2978_s12 = smov 104   ;;  %vm620_vm5 = vcmask 1043459   ;;  %vm622_vm6 = vcmask 1044484   ;;  %vm624_vm7 = vcmask 1045509  }
  0x1a   : > { %s354_s29 = scalar_lea.vmem %s3931_s0, %s2632_s26  ;;  %v452_v23 = vunpack.c.0.s8 %v451_v21  ;;  %vm626_vm8 = vcmask 1046534   ;;  %vm628_vm9 = vcmask 1047559   ;;  %vm872_vm10 = vcmask 589312   ;;  %s2979_s18 = smov 64  }
  0x1b   : > { %v356_v1 = vld [vmem:[%s354_s29] sm:$0xff]  ;;  %s2974_s29 = smov 96   ;;  %vm1327_vm11 = vcmask 654912   ;;  %vm1774_vm12 = vcmask 720512   ;;  %vm2221_vm13 = vcmask 786112   ;;  %vm980_vm14 = vcmask 60416  }
  0x1c   : > { %360 = vperm.xlu0 %2820, %v356_v1   ;;  %2738 = vmatpush3.bf16.msra.mxu0 %v2825_v5  ;;  %v455_v25 = vsub.s32 %v452_v23, %v3123_v24  ;;  %vm1435_vm15 = vcmask 126016   ;;  %s2686_s25 = sshll.u32 %s3057_s17, 7 }
  0x1d   : > { %2751 = vmatprep.subr.bf16.mxu0 %v3942_v4 }
  0x20   : > { %2821 = vset.pattern.permute.xlu0 %v2971_v2 }
  0x21   : > { %370 = vperm.xlu0 %2821, %v356_v1  }
  0x25   : > { %2823 = vset.pattern.permute.xlu0 %v2970_v0 }
  0x9b   : > { %v361_v6 = vpop.permute.xlu0 %360 }
  0x9c   : > { %v367_v10 = vmul.f32 %v2633_v7, %v361_v6 }
  0xa0   : > { %v371_v9 = vpop.permute.xlu0 %370 }
  0xa1   : > { %v377_v11 = vmul.f32 %v2634_v8, %v371_v9 }
  0xa3   : > { %v378_v13 = vadd.f32 %v377_v11, %v367_v10 }
  0xa5   : > { %v3112_v14 = vadd.f32 %v2635_v12, %v378_v13 }
  0xa7   : > { %3952 = vst [vmem:[#allocation6_spill] sm:$0xff] %v3112_v14  ;;  %v387_v15 = vpack.c.bf16 %v3112_v14, %v3112_v14 }
  0xa9   : > { %2740 = vmatmul.mubr.msk.bf16.vlgmr.msra.gmra.mrb[0].mxu0 %vm404_vm1, %v387_v15 }
  0xaa   : > { %2755 = vmatprep.mubr.msk.bf16.mxu0 %vm2973_vm0, %v3942_v4 }
 0x17c   : > { %v3119_v16 = vpop.f32.mrb[0].mxu0 }
 0x17d   : > { %538 = vrot.lane.b32.xlu1 %v3119_v16, %s2974_s29  ;;  %v2741_v17 = vpop.f32.mrb[1].mxu0  ;;  %v456_v26 = vrot.slane %v3119_v16, %v455_v25  ;;  %v449_v38 = vcombine.high %v3119_v16, %v3119_v16 }
 0x17e   : > { %v445_v18 = vpop.f32.mrb[2].mxu0 }
 0x17f   : > { %v2742_v19 = vpop.f32.mrb[3].mxu0  ;;  %v472_v27 = vrot.slane %v456_v26, %v455_v25  ;;  %v464_v30 = vcombine.high %v456_v26, %v456_v26  ;;  %v463_v41 = vrot.slane %v449_v38, %v455_v25 }
 0x181   : > { %v494_v29 = vcombine.high %v472_v27, %v472_v27  ;;  %v501_v31 = vrot.slane %v472_v27, %v3128_v28  ;;  %v486_v33 = vrot.slane %v464_v30, %v455_v25  ;;  %v465_v43 = vcombine.high %v463_v41, %v463_v41 }
 0x182   : > { %v479_v45 = vrot.slane %v463_v41, %v455_v25 }
 0x183   : > { %v509_v32 = vrot.slane %v494_v29, %v3128_v28  ;;  %v505_v37 = vrot.slane %v486_v33, %v3128_v28  ;;  %v496_v40 = vcombine.high %v486_v33, %v486_v33  ;;  %v493_v46 = vrot.slane %v465_v43, %v455_v25 }
 0x184   : > { %v517_v47 = vrot.slane %v479_v45, %v3128_v28  ;;  %v495_v51 = vcombine.high %v479_v45, %v479_v45 }
 0x185   : > { %v513_v42 = vrot.slane %v496_v40, %v3128_v28  ;;  %v521_v48 = vrot.slane %v493_v46, %v3128_v28  ;;  %v497_v52 = vcombine.high %v493_v46, %v493_v46 }
 0x186   : > { %v525_v53 = vrot.slane %v495_v51, %v3128_v28 }
 0x187   : > { %v529_v54 = vrot.slane %v497_v52, %v3128_v28 }
 0x1ef   : > { %v539_v34 = vpop.permute.xlu1 %538 }
 0x1f0   : > { %v541_v35 = vmul.f32 %v539_v34, %v501_v31  ;;  %v543_v36 = vmul.f32 %v539_v34, %v509_v32  ;;  %v542_v39 = vmul.f32 %v539_v34, %v505_v37  ;;  %v544_v44 = vmul.f32 %v539_v34, %v513_v42 }
 0x1f1   : > { %v545_v49 = vmul.f32 %v539_v34, %v517_v47  ;;  %v546_v50 = vmul.f32 %v539_v34, %v521_v48  ;;  %v547_v55 = vmul.f32 %v539_v34, %v525_v53  ;;  %v548_v56 = vmul.f32 %v539_v34, %v529_v54 }
 0x1f2   : > { %990 = vrot.lane.b32.xlu1 %v541_v35, %s2976_s30  ;;  %994 = vrot.lane.b32.xlu0 %v543_v36, %s2976_s30  ;;  %v550_v57 = vsel %vm549_vm2, %v541_v35, 0.0  ;;  %v556_v58 = vsel %vm549_vm2, %v543_v36, 0.0  ;;  %v559_v59 = vsel %vm549_vm2, %v544_v44, 0.0  ;;  %v553_v61 = vsel %vm549_vm2, %v542_v39, 0.0 }
 0x1f3   : > { %v562_v60 = vsel %vm549_vm2, %v545_v49, 0.0  ;;  %v565_v62 = vsel %vm549_vm2, %v546_v50, 0.0  ;;  %v568_v63 = vsel %vm549_vm2, %v547_v55, 0.0  ;;  %v571_v0 = vsel %vm549_vm2, %v548_v56, 0.0 }
 0x1f6   : > { %1439 = vrot.lane.b32.xlu0 %v542_v39, %s2977_s11  ;;  %992 = vrot.lane.b32.xlu1 %v542_v39, %s2976_s30 }
 0x1fa   : > { %1441 = vrot.lane.b32.xlu0 %v543_v36, %s2977_s11  ;;  %1437 = vrot.lane.b32.xlu1 %v541_v35, %s2977_s11 }
 0x1fe   : > { %1886 = vrot.lane.b32.xlu0 %v542_v39, %s2978_s12  ;;  %996 = vrot.lane.b32.xlu1 %v544_v44, %s2976_s30 }
 0x202   : > { %1443 = vrot.lane.b32.xlu0 %v544_v44, %s2977_s11  ;;  %1884 = vrot.lane.b32.xlu1 %v541_v35, %s2978_s12 }
 0x206   : > { %998 = vrot.lane.b32.xlu1 %v545_v49, %s2976_s30  ;;  %1000 = vrot.lane.b32.xlu0 %v546_v50, %s2976_s30 }
 0x20a   : > { %1888 = vrot.lane.b32.xlu1 %v543_v36, %s2978_s12  ;;  %1890 = vrot.lane.b32.xlu0 %v544_v44, %s2978_s12 }
 0x20e   : > { %1445 = vrot.lane.b32.xlu1 %v545_v49, %s2977_s11  ;;  %1447 = vrot.lane.b32.xlu0 %v546_v50, %s2977_s11 }
 0x212   : > { %1002 = vrot.lane.b32.xlu1 %v547_v55, %s2976_s30  ;;  %1004 = vrot.lane.b32.xlu0 %v548_v56, %s2976_s30  ;;  %s3888_s30 = scalar_lea.hbm %s3941_s10, %s2686_s25 }
 0x216   : > { %1892 = vrot.lane.b32.xlu1 %v545_v49, %s2978_s12  ;;  %1894 = vrot.lane.b32.xlu0 %v546_v50, %s2978_s12 }
 0x21a   : > { %1449 = vrot.lane.b32.xlu1 %v547_v55, %s2977_s11  ;;  %1896 = vrot.lane.b32.xlu0 %v547_v55, %s2978_s12 }
 0x21e   : > { %1451 = vrot.lane.b32.xlu1 %v548_v56, %s2977_s11 }
 0x222   : > { %1898 = vrot.lane.b32.xlu1 %v548_v56, %s2978_s12  ;;  %v583_v56 = vand.u32 127, %v453_v22  ;;  %s348_s12 = sand.u32 1, %s2960_s14  }
 0x223   : > { %s2555_s17 = scalar_lea.sflag [#allocation4], %s348_s12 }
 0x239   : > { %551 = vadd.xlane.f32.xlu0 %v550_v57 }
 0x23d   : > { %557 = vadd.xlane.f32.xlu0 %v556_v58  ;;  %v3202_v58 = vsub.s32 %v583_v56, %v3123_v24 }
 0x241   : > { %560 = vadd.xlane.f32.xlu0 %v559_v59 }
 0x245   : > { %563 = vadd.xlane.f32.xlu0 %v562_v60 }
 0x246   : > { %554 = vadd.xlane.f32.xlu1 %v553_v61 }
 0x24a   : > { %566 = vadd.xlane.f32.xlu1 %v565_v62 }
 0x24e   : > { %569 = vadd.xlane.f32.xlu1 %v568_v63 }
 0x252   : > { %572 = vadd.xlane.f32.xlu1 %v571_v0 }
 0x264   : > { %v991_v1 = vpop.permute.xlu1 %990  ;;  %v995_v2 = vpop.permute.xlu0 %994 }
 0x265   : > { %v1014_v3 = vsel %vm549_vm2, %v991_v1, 0.0  ;;  %v1020_v11 = vsel %vm549_vm2, %v995_v2, 0.0 }
 0x266   : > { %1015 = vadd.xlane.f32.xlu0 %v1014_v3 }
 0x268   : > { %v1440_v5 = vpop.permute.xlu0 %1439  ;;  %v993_v6 = vpop.permute.xlu1 %992 }
 0x269   : > { %v1017_v7 = vsel %vm549_vm2, %v993_v6, 0.0  ;;  %v1464_v17 = vsel %vm549_vm2, %v1440_v5, 0.0 }
 0x26a   : > { %1018 = vadd.xlane.f32.xlu1 %v1017_v7 }
 0x26c   : > { %v1442_v8 = vpop.permute.xlu0 %1441  ;;  %v1438_v9 = vpop.permute.xlu1 %1437 }
 0x26d   : > { %v1461_v10 = vsel %vm549_vm2, %v1438_v9, 0.0  ;;  %v1467_v15 = vsel %vm549_vm2, %v1442_v8, 0.0 }
 0x26e   : > { %1462 = vadd.xlane.f32.xlu0 %v1461_v10  ;;  %1021 = vadd.xlane.f32.xlu1 %v1020_v11 }
 0x270   : > { %v1887_v12 = vpop.permute.xlu0 %1886  ;;  %v997_v13 = vpop.permute.xlu1 %996 }
 0x271   : > { %v1911_v20 = vsel %vm549_vm2, %v1887_v12, 0.0  ;;  %v1023_v21 = vsel %vm549_vm2, %v997_v13, 0.0 }
 0x272   : > { %1468 = vadd.xlane.f32.xlu0 %v1467_v15  ;;  %1465 = vadd.xlane.f32.xlu1 %v1464_v17 }
 0x274   : > { %v1444_v18 = vpop.permute.xlu0 %1443  ;;  %v1885_v19 = vpop.permute.xlu1 %1884 }
 0x275   : > { %v1908_v27 = vsel %vm549_vm2, %v1885_v19, 0.0  ;;  %v1470_v32 = vsel %vm549_vm2, %v1444_v18, 0.0 }
 0x276   : > { %1912 = vadd.xlane.f32.xlu0 %v1911_v20  ;;  %1024 = vadd.xlane.f32.xlu1 %v1023_v21 }
 0x278   : > { %v999_v23 = vpop.permute.xlu1 %998  ;;  %v1001_v25 = vpop.permute.xlu0 %1000 }
 0x279   : > { %v1026_v26 = vsel %vm549_vm2, %v999_v23, 0.0  ;;  %v1029_v35 = vsel %vm549_vm2, %v1001_v25, 0.0 }
 0x27a   : > { %1027 = vadd.xlane.f32.xlu0 %v1026_v26  ;;  %1909 = vadd.xlane.f32.xlu1 %v1908_v27 }
 0x27c   : > { %v1889_v29 = vpop.permute.xlu1 %1888  ;;  %v1891_v30 = vpop.permute.xlu0 %1890 }
 0x27d   : > { %v1914_v31 = vsel %vm549_vm2, %v1889_v29, 0.0  ;;  %v1917_v39 = vsel %vm549_vm2, %v1891_v30, 0.0 }
 0x27e   : > { %1915 = vadd.xlane.f32.xlu0 %v1914_v31  ;;  %1471 = vadd.xlane.f32.xlu1 %v1470_v32 }
 0x280   : > { %v1446_v33 = vpop.permute.xlu1 %1445  ;;  %v1448_v34 = vpop.permute.xlu0 %1447 }
 0x281   : > { %v1473_v36 = vsel %vm549_vm2, %v1446_v33, 0.0  ;;  %v1476_v40 = vsel %vm549_vm2, %v1448_v34, 0.0 }
 0x282   : > { %1030 = vadd.xlane.f32.xlu0 %v1029_v35  ;;  %1474 = vadd.xlane.f32.xlu1 %v1473_v36 }
 0x284   : > { %v1003_v37 = vpop.permute.xlu1 %1002  ;;  %v1005_v38 = vpop.permute.xlu0 %1004 }
 0x285   : > { %v1032_v43 = vsel %vm549_vm2, %v1003_v37, 0.0  ;;  %v1035_v44 = vsel %vm549_vm2, %v1005_v38, 0.0 }
 0x286   : > { %1918 = vadd.xlane.f32.xlu0 %v1917_v39  ;;  %1477 = vadd.xlane.f32.xlu1 %v1476_v40 }
 0x288   : > { %v1893_v41 = vpop.permute.xlu1 %1892  ;;  %v1895_v42 = vpop.permute.xlu0 %1894 }
 0x289   : > { %v1920_v46 = vsel %vm549_vm2, %v1893_v41, 0.0  ;;  %v1923_v47 = vsel %vm549_vm2, %v1895_v42, 0.0 }
 0x28a   : > { %1033 = vadd.xlane.f32.xlu0 %v1032_v43  ;;  %1036 = vadd.xlane.f32.xlu1 %v1035_v44 }
 0x28c   : > { %v1450_v45 = vpop.permute.xlu1 %1449  ;;  %v1897_v48 = vpop.permute.xlu0 %1896 }
 0x28d   : > { %v1479_v50 = vsel %vm549_vm2, %v1450_v45, 0.0  ;;  %v1926_v51 = vsel %vm549_vm2, %v1897_v48, 0.0 }
 0x28e   : > { %1921 = vadd.xlane.f32.xlu0 %v1920_v46  ;;  %1924 = vadd.xlane.f32.xlu1 %v1923_v47 }
 0x290   : > { %v1452_v49 = vpop.permute.xlu1 %1451 }
 0x291   : > { %v1482_v52 = vsel %vm549_vm2, %v1452_v49, 0.0 }
 0x292   : > { %1480 = vadd.xlane.f32.xlu0 %v1479_v50  ;;  %1927 = vadd.xlane.f32.xlu1 %v1926_v51 }
 0x294   : > { %v1899_v53 = vpop.permute.xlu1 %1898 }
 0x295   : > { %v1929_v54 = vsel %vm549_vm2, %v1899_v53, 0.0 }
 0x296   : > { %1483 = vadd.xlane.f32.xlu0 %v1482_v52 }
 0x29a   : > { %1930 = vadd.xlane.f32.xlu0 %v1929_v54 }
 0x2c6   : > { %v3196_v55 = vpop.xlane.xlu0 %551 }
 0x2c7   : > { %v587_v61 = vrot.slane %v3196_v55, %v3202_v58 }
 0x2ca   : > { %v3199_v57 = vpop.xlane.xlu0 %557 }
 0x2cb   : > { %v595_v22 = vrot.slane %v3199_v57, %v3202_v58 }
 0x2ce   : > { %v3204_v59 = vpop.xlane.xlu0 %560 }
 0x2cf   : > { %v599_v2 = vrot.slane %v3204_v59, %v3202_v58 }
 0x2d2   : > { %v3220_v3 = vpop.xlane.xlu0 %563 }
 0x2d3   : > { %v3206_v60 = vpop.xlane.xlu1 %554  ;;  %v603_v6 = vrot.slane %v3220_v3, %v3202_v58 }
 0x2d4   : > { %v591_v62 = vrot.slane %v3206_v60, %v3202_v58 }
 0x2d6   : > { %v617_v63 = vsel %vm616_vm3, %v591_v62, %v587_v61 }
 0x2d7   : > { %v619_v0 = vsel %vm618_vm4, %v595_v22, %v617_v63  ;;  %v3216_v1 = vpop.xlane.xlu1 %566 }
 0x2d8   : > { %v621_v5 = vsel %vm620_vm5, %v599_v2, %v619_v0  ;;  %v607_v8 = vrot.slane %v3216_v1, %v3202_v58 }
 0x2d9   : > { %v623_v10 = vsel %vm622_vm6, %v603_v6, %v621_v5 }
 0x2da   : > { %v625_v13 = vsel %vm624_vm7, %v607_v8, %v623_v10 }
 0x2db   : > { %v3225_v7 = vpop.xlane.xlu1 %569 }
 0x2dc   : > { %v611_v9 = vrot.slane %v3225_v7, %v3202_v58 }
 0x2de   : > { %v627_v15 = vsel %vm626_vm8, %v611_v9, %v625_v13 }
 0x2df   : > { %v3232_v11 = vpop.xlane.xlu1 %572 }
 0x2e0   : > { %v615_v12 = vrot.slane %v3232_v11, %v3202_v58 }
 0x2e2   : > { %v629_v17 = vsel %vm628_vm9, %v615_v12, %v627_v15 }
 0x2e3   : > { %v631_v18 = vsel %vm549_vm2, %v629_v17, -inf }
 0x2e4   : > { %632 = vmax.xlane.f32.xlu1 %v631_v18 }
 0x2f3   : > { %v3240_v19 = vpop.xlane.xlu0 %1015 }
 0x2f4   : > { %v1049_v38 = vrot.slane %v3240_v19, %v3202_v58 }
 0x2f7   : > { %v3242_v20 = vpop.xlane.xlu1 %1018 }
 0x2f8   : > { %v1053_v36 = vrot.slane %v3242_v20, %v3202_v58 }
 0x2fa   : > { %v1078_v43 = vsel %vm616_vm3, %v1053_v36, %v1049_v38 }
 0x2fb   : > { %v3244_v21 = vpop.xlane.xlu0 %1462  ;;  %v3246_v23 = vpop.xlane.xlu1 %1021 }
 0x2fc   : > { %v1057_v37 = vrot.slane %v3246_v23, %v3202_v58  ;;  %v1496_v62 = vrot.slane %v3244_v21, %v3202_v58 }
 0x2fe   : > { %v1079_v45 = vsel %vm618_vm4, %v1057_v37, %v1078_v43 }
 0x2ff   : > { %v3248_v25 = vpop.xlane.xlu0 %1468  ;;  %v3250_v26 = vpop.xlane.xlu1 %1465 }
 0x300   : > { %v1500_v53 = vrot.slane %v3250_v26, %v3202_v58  ;;  %v1504_v0 = vrot.slane %v3248_v25, %v3202_v58 }
 0x302   : > { %v1525_v2 = vsel %vm616_vm3, %v1500_v53, %v1496_v62 }
 0x303   : > { %v3252_v27 = vpop.xlane.xlu0 %1912  ;;  %v3254_v29 = vpop.xlane.xlu1 %1024  ;;  %v1526_v17 = vsel %vm618_vm4, %v1504_v0, %v1525_v2 }
 0x304   : > { %v1061_v39 = vrot.slane %v3254_v29, %v3202_v58  ;;  %v1947_v12 = vrot.slane %v3252_v27, %v3202_v58 }
 0x306   : > { %v1080_v46 = vsel %vm620_vm5, %v1061_v39, %v1079_v45 }
 0x307   : > { %v3256_v30 = vpop.xlane.xlu0 %1027  ;;  %v3258_v31 = vpop.xlane.xlu1 %1909 }
 0x308   : > { %v1065_v42 = vrot.slane %v3256_v30, %v3202_v58  ;;  %v1943_v5 = vrot.slane %v3258_v31, %v3202_v58 }
 0x30a   : > { %v1081_v49 = vsel %vm622_vm6, %v1065_v42, %v1080_v46  ;;  %v1972_v37 = vsel %vm616_vm3, %v1947_v12, %v1943_v5  ;;  %v3367_v12 = vsub.s32 5, %v3123_v24 }
 0x30b   : > { %v3260_v32 = vpop.xlane.xlu0 %1915  ;;  %v3262_v33 = vpop.xlane.xlu1 %1471 }
 0x30c   : > { %v1508_v6 = vrot.slane %v3262_v33, %v3202_v58  ;;  %v1951_v8 = vrot.slane %v3260_v32, %v3202_v58 }
 0x30e   : > { %v1527_v38 = vsel %vm620_vm5, %v1508_v6, %v1526_v17  ;;  %v1973_v42 = vsel %vm618_vm4, %v1951_v8, %v1972_v37  ;;  %v3361_v8 = vsub.s32 1, %v3123_v24 }
 0x30f   : > { %v3264_v34 = vpop.xlane.xlu0 %1030  ;;  %v3266_v35 = vpop.xlane.xlu1 %1474 }
 0x310   : > { %v1069_v44 = vrot.slane %v3264_v34, %v3202_v58  ;;  %v1512_v9 = vrot.slane %v3266_v35, %v3202_v58 }
 0x312   : > { %v1082_v52 = vsel %vm624_vm7, %v1069_v44, %v1081_v49  ;;  %v1528_v43 = vsel %vm622_vm6, %v1512_v9, %v1527_v38  ;;  %v3364_v9 = vsub.s32 2, %v3123_v24  ;;  %v3379_v38 = vsub.s32 4, %v3123_v24 }
 0x313   : > { %v3276_v40 = vpop.xlane.xlu0 %1918  ;;  %v3278_v41 = vpop.xlane.xlu1 %1477 }
 0x314   : > { %v1955_v13 = vrot.slane %v3276_v40, %v3202_v58  ;;  %v1516_v15 = vrot.slane %v3278_v41, %v3202_v58 }
 0x316   : > { %v1974_v45 = vsel %vm620_vm5, %v1955_v13, %v1973_v42  ;;  %v3370_v13 = vsub.s32 3, %v3123_v24 }
 0x317   : > { %v3287_v47 = vpop.xlane.xlu0 %1033  ;;  %v3289_v48 = vpop.xlane.xlu1 %1036 }
 0x318   : > { %v1073_v50 = vrot.slane %v3287_v47, %v3202_v58  ;;  %v1077_v51 = vrot.slane %v3289_v48, %v3202_v58 }
 0x31a   : > { %v1083_v54 = vsel %vm626_vm8, %v1073_v50, %v1082_v52  ;;  %v1529_v50 = vsel %vm624_vm7, %v1516_v15, %v1528_v43  ;;  %v3373_v15 = vsub.s32 6, %v3123_v24 }
 0x31b   : > { %v3300_v56 = vpop.xlane.xlu0 %1921  ;;  %v1084_v61 = vsel %vm628_vm9, %v1077_v51, %v1083_v54  ;;  %v3305_v22 = vpop.xlane.xlu1 %1924 }
 0x31c   : > { %v1086_v63 = vsel %vm549_vm2, %v1084_v61, -inf  ;;  %v1959_v18 = vrot.slane %v3300_v56, %v3202_v58  ;;  %v1963_v46 = vrot.slane %v3305_v22, %v3202_v58 }
 0x31d   : > { %1087 = vmax.xlane.f32.xlu0 %v1086_v63 }
 0x31e   : > { %v1975_v51 = vsel %vm622_vm6, %v1959_v18, %v1974_v45 }
 0x31f   : > { %v3319_v10 = vpop.xlane.xlu0 %1480  ;;  %v3334_v39 = vpop.xlane.xlu1 %1927  ;;  %v1976_v0 = vsel %vm624_vm7, %v1963_v46, %v1975_v51 }
 0x320   : > { %v1520_v36 = vrot.slane %v3319_v10, %v3202_v58  ;;  %v1967_v52 = vrot.slane %v3334_v39, %v3202_v58 }
 0x322   : > { %v1530_v53 = vsel %vm626_vm8, %v1520_v36, %v1529_v50  ;;  %v1977_v2 = vsel %vm626_vm8, %v1967_v52, %v1976_v0  ;;  %v3387_v50 = vsub.s32 7, %v3123_v24 }
 0x323   : > { %v3338_v44 = vpop.xlane.xlu0 %1483 }
 0x324   : > { %v1524_v49 = vrot.slane %v3338_v44, %v3202_v58 }
 0x326   : > { %v1531_v54 = vsel %vm628_vm9, %v1524_v49, %v1530_v53 }
 0x327   : > { %v3351_v61 = vpop.xlane.xlu0 %1930  ;;  %v1533_v62 = vsel %vm549_vm2, %v1531_v54, -inf }
 0x328   : > { %v1971_v63 = vrot.slane %v3351_v61, %v3202_v58  ;;  %1534 = vmax.xlane.f32.xlu1 %v1533_v62 }
 0x32a   : > { %v1978_v5 = vsel %vm628_vm9, %v1971_v63, %v1977_v2 }
 0x32b   : > { %v1980_v6 = vsel %vm549_vm2, %v1978_v5, -inf }
 0x32c   : > { %1981 = vmax.xlane.f32.xlu0 %v1980_v6 }
 0x371   : > { %v633_v17 = vpop.xlane.xlu1 %632 }
 0x372   : > { %v638_v18 = vrot.slane %v633_v17, %v3128_v28  ;;  %v642_v36 = vrot.slane %v633_v17, %v3361_v8  ;;  %v646_v37 = vrot.slane %v633_v17, %v3364_v9  ;;  %v658_v42 = vrot.slane %v633_v17, %v3367_v12 }
 0x373   : > { %v650_v43 = vrot.slane %v633_v17, %v3370_v13  ;;  %v662_v51 = vrot.slane %v633_v17, %v3373_v15  ;;  %v654_v62 = vrot.slane %v633_v17, %v3379_v38 }
 0x374   : > { %v675_v45 = vsub.f32 %v3196_v55, %v638_v18  ;;  %v676_v46 = vsub.f32 %v3206_v60, %v642_v36  ;;  %v677_v49 = vsub.f32 %v3199_v57, %v646_v37  ;;  %v680_v52 = vsub.f32 %v3216_v1, %v658_v42 }
 0x375   : > { %v678_v63 = vsub.f32 %v3204_v59, %v650_v43  ;;  %v666_v55 = vrot.slane %v633_v17, %v3387_v50  ;;  %v681_v60 = vsub.f32 %v3225_v7, %v662_v51  ;;  %v679_v24 = vsub.f32 %v3220_v3, %v654_v62 }
 0x376   : > { %v683_v53 = vmul.f32 1.442695, %v675_v45  ;;  %v685_v54 = vmul.f32 1.442695, %v676_v46  ;;  %v687_v0 = vmul.f32 1.442695, %v677_v49 }
 0x377   : > { %v693_v57 = vmul.f32 1.442695, %v680_v52  ;;  %v689_v2 = vmul.f32 1.442695, %v678_v63  ;;  %v682_v1 = vsub.f32 %v3232_v11, %v666_v55  ;;  %v695_v5 = vmul.f32 1.442695, %v681_v60 }
 0x378   : > { %2834 = vpow2.f32 %v683_v53  ;;  %v691_v6 = vmul.f32 1.442695, %v679_v24 }
 0x379   : > { %2836 = vpow2.f32 %v685_v54  ;;  %v697_v59 = vmul.f32 1.442695, %v682_v1 }
 0x37a   : > { %2838 = vpow2.f32 %v687_v0 }
 0x37b   : > { %2840 = vpow2.f32 %v693_v57 }
 0x37c   : > { %2842 = vpow2.f32 %v689_v2 }
 0x37d   : > { %2844 = vpow2.f32 %v695_v5 }
 0x37e   : > { %2846 = vpow2.f32 %v691_v6 }
 0x37f   : > { %2848 = vpow2.f32 %v697_v59 }
 0x382   : > { %v3397_v18 = vpop.eup %2834 }
 0x383   : > { %v3399_v36 = vpop.eup %2836  ;;  %708 = vperm.xlu1 %2822, %v3397_v18  }
 0x384   : > { %711 = vperm.xlu0 %2823, %v3399_v36   ;;  %v3403_v3 = vpop.eup %2838 }
 0x385   : > { %v3405_v7 = vpop.eup %2840 }
 0x386   : > { %v3409_v11 = vpop.eup %2842 }
 0x387   : > { %714 = vperm.xlu1 %2822, %v3403_v3   ;;  %v3411_v17 = vpop.eup %2844 }
 0x388   : > { %723 = vperm.xlu0 %2823, %v3405_v7   ;;  %v3415_v37 = vpop.eup %2846 }
 0x389   : > { %v3417_v42 = vpop.eup %2848 }
 0x38b   : > { %717 = vperm.xlu1 %2822, %v3409_v11  }
 0x38c   : > { %726 = vperm.xlu0 %2823, %v3411_v17  }
 0x38f   : > { %720 = vperm.xlu1 %2822, %v3415_v37  }
 0x390   : > { %729 = vperm.xlu0 %2823, %v3417_v42  }
 0x3aa   : > { %v3421_v43 = vpop.xlane.xlu0 %1087 }
 0x3ab   : > { %v1093_v45 = vrot.slane %v3421_v43, %v3128_v28  ;;  %v1097_v46 = vrot.slane %v3421_v43, %v3361_v8  ;;  %v1105_v49 = vrot.slane %v3421_v43, %v3370_v13  ;;  %v1101_v51 = vrot.slane %v3421_v43, %v3364_v9 }
 0x3ad   : > { %v1130_v52 = vsub.f32 %v3240_v19, %v1093_v45  ;;  %v1131_v53 = vsub.f32 %v3242_v20, %v1097_v46  ;;  %v1133_v54 = vsub.f32 %v3254_v29, %v1105_v49  ;;  %v1132_v0 = vsub.f32 %v3246_v23, %v1101_v51 }
 0x3af   : > { %v1138_v62 = vmul.f32 1.442695, %v1130_v52  ;;  %v1144_v63 = vmul.f32 1.442695, %v1133_v54  ;;  %v1140_v55 = vmul.f32 1.442695, %v1131_v53 }
 0x3b0   : > { %v1142_v60 = vmul.f32 1.442695, %v1132_v0 }
 0x3b1   : > { %2850 = vpow2.f32 %v1138_v62 }
 0x3b2   : > { %2852 = vpow2.f32 %v1144_v63 }
 0x3b3   : > { %2854 = vpow2.f32 %v1140_v55 }
 0x3b4   : > { %2856 = vpow2.f32 %v1142_v60 }
 0x3b5   : > { %v3435_v57 = vpop.xlane.xlu1 %1534 }
 0x3b6   : > { %v1540_v24 = vrot.slane %v3435_v57, %v3128_v28  ;;  %v1544_v19 = vrot.slane %v3435_v57, %v3361_v8  ;;  %v1548_v29 = vrot.slane %v3435_v57, %v3364_v9  ;;  %v1552_v59 = vrot.slane %v3435_v57, %v3370_v13 }
 0x3b7   : > { %v1556_v52 = vrot.slane %v3435_v57, %v3379_v38 }
 0x3b8   : > { %v1577_v20 = vsub.f32 %v3244_v21, %v1540_v24  ;;  %v1578_v23 = vsub.f32 %v3250_v26, %v1544_v19  ;;  %v1579_v21 = vsub.f32 %v3248_v25, %v1548_v29  ;;  %v1580_v53 = vsub.f32 %v3262_v33, %v1552_v59 }
 0x3b9   : > { %v3445_v2 = vpop.xlane.xlu0 %1981  ;;  %v1109_v25 = vrot.slane %v3421_v43, %v3379_v38  ;;  %v1581_v55 = vsub.f32 %v3266_v35, %v1556_v52 }
 0x3ba   : > { %v1585_v1 = vmul.f32 1.442695, %v1577_v20  ;;  %v1987_v6 = vrot.slane %v3445_v2, %v3128_v28  ;;  %v1587_v45 = vmul.f32 1.442695, %v1578_v23  ;;  %v1991_v26 = vrot.slane %v3445_v2, %v3361_v8 }
 0x3bb   : > { %v3447_v5 = vpop.eup %2850  ;;  %v1589_v54 = vmul.f32 1.442695, %v1579_v21  ;;  %v1591_v60 = vmul.f32 1.442695, %v1580_v53  ;;  %v1134_v33 = vsub.f32 %v3256_v30, %v1109_v25  ;;  %v1995_v24 = vrot.slane %v3445_v2, %v3364_v9 }
 0x3bc   : > { %2858 = vpow2.f32 %v1585_v1  ;;  %1163 = vperm.xlu1 %2822, %v3447_v5   ;;  %v3457_v46 = vpop.eup %2852  ;;  %v2024_v51 = vsub.f32 %v3258_v31, %v1987_v6  ;;  %v2025_v62 = vsub.f32 %v3252_v27, %v1991_v26  ;;  %v1560_v31 = vrot.slane %v3435_v57, %v3367_v12 }
 0x3bd   : > { %v3459_v49 = vpop.eup %2854  ;;  %1172 = vperm.xlu0 %2823, %v3457_v46   ;;  %2860 = vpow2.f32 %v1587_v45  ;;  %v1121_v20 = vrot.slane %v3421_v43, %v3387_v50  ;;  %v1593_v35 = vmul.f32 1.442695, %v1581_v55  ;;  %v1113_v23 = vrot.slane %v3421_v43, %v3367_v12 }
 0x3be   : > { %v2032_v63 = vmul.f32 1.442695, %v2024_v51  ;;  %v3470_v0 = vpop.eup %2856  ;;  %v2034_v19 = vmul.f32 1.442695, %v2025_v62  ;;  %v1582_v29 = vsub.f32 %v3278_v41, %v1560_v31  ;;  %v1146_v30 = vmul.f32 1.442695, %v1134_v33 }
 0x3bf   : > { %v2026_v1 = vsub.f32 %v3260_v32, %v1995_v24  ;;  %v1137_v59 = vsub.f32 %v3289_v48, %v1121_v20  ;;  %v2007_v41 = vrot.slane %v3445_v2, %v3367_v12  ;;  %v1135_v45 = vsub.f32 %v3264_v34, %v1113_v23 }
 0x3c0   : > { %1166 = vperm.xlu1 %2822, %v3459_v49   ;;  %2862 = vpow2.f32 %v2032_v63  ;;  %v1595_v21 = vmul.f32 1.442695, %v1582_v29  ;;  %v1999_v26 = vrot.slane %v3445_v2, %v3370_v13  ;;  %v2011_v53 = vrot.slane %v3445_v2, %v3373_v15 }
 0x3c1   : > { %2864 = vpow2.f32 %v1589_v54  ;;  %v2036_v51 = vmul.f32 1.442695, %v2026_v1  ;;  %v1152_v48 = vmul.f32 1.442695, %v1137_v59  ;;  %v2029_v25 = vsub.f32 %v3305_v22, %v2007_v41 }
 0x3c2   : > { %2866 = vpow2.f32 %v1591_v60  ;;  %v1117_v34 = vrot.slane %v3421_v43, %v3373_v15  ;;  %v1148_v54 = vmul.f32 1.442695, %v1135_v45  ;;  %v2027_v62 = vsub.f32 %v3276_v40, %v1999_v26 }
 0x3c3   : > { %2868 = vpow2.f32 %v2034_v19  ;;  %v2030_v55 = vsub.f32 %v3334_v39, %v2011_v53  ;;  %v2042_v60 = vmul.f32 1.442695, %v2029_v25  ;;  %v2003_v43 = vrot.slane %v3445_v2, %v3379_v38 }
 0x3c4   : > { %1169 = vperm.xlu1 %2822, %v3470_v0   ;;  %2870 = vpow2.f32 %v1593_v35  ;;  %v1136_v22 = vsub.f32 %v3287_v47, %v1117_v34  ;;  %v2038_v40 = vmul.f32 1.442695, %v2027_v62  ;;  %v1564_v20 = vrot.slane %v3435_v57, %v3373_v15 }
 0x3c5   : > { %2872 = vpow2.f32 %v1146_v30  ;;  %v2044_v19 = vmul.f32 1.442695, %v2030_v55  ;;  %v2028_v47 = vsub.f32 %v3300_v56, %v2003_v43  ;;  %v1568_v23 = vrot.slane %v3435_v57, %v3387_v50 }
 0x3c6   : > { %v3479_v27 = vpop.eup %2858  ;;  %2874 = vpow2.f32 %v1595_v21  ;;  %v1150_v39 = vmul.f32 1.442695, %v1136_v22  ;;  %v1583_v30 = vsub.f32 %v3319_v10, %v1564_v20  ;;  %v2015_v45 = vrot.slane %v3445_v2, %v3387_v50 }
 0x3c7   : > { %v3488_v6 = vpop.eup %2860  ;;  %2876 = vpow2.f32 %v2036_v51  ;;  %v2040_v1 = vmul.f32 1.442695, %v2028_v47  ;;  %v1584_v21 = vsub.f32 %v3338_v44, %v1568_v23 }
 0x3c8   : > { %1610 = vperm.xlu1 %2822, %v3479_v27   ;;  %2878 = vpow2.f32 %v1152_v48  ;;  %v1597_v41 = vmul.f32 1.442695, %v1583_v30  ;;  %v2031_v51 = vsub.f32 %v3351_v61, %v2015_v45 }
 0x3c9   : > { %2880 = vpow2.f32 %v1148_v54  ;;  %v1599_v10 = vmul.f32 1.442695, %v1584_v21 }
 0x3ca   : > { %v3497_v32 = vpop.eup %2862  ;;  %2882 = vpow2.f32 %v2042_v60  ;;  %v2046_v2 = vmul.f32 1.442695, %v2031_v51 }
 0x3cb   : > { %v3499_v52 = vpop.eup %2864  ;;  %2057 = vperm.xlu0 %2823, %v3497_v32   ;;  %2884 = vpow2.f32 %v2038_v40 }
 0x3cc   : > { %1613 = vperm.xlu1 %2822, %v3488_v6   ;;  %v3509_v63 = vpop.eup %2866  ;;  %2886 = vpow2.f32 %v2044_v19 }
 0x3cd   : > { %v3511_v31 = vpop.eup %2868  ;;  %2888 = vpow2.f32 %v1150_v39 }
 0x3ce   : > { %v3519_v33 = vpop.eup %2870  ;;  %2890 = vpow2.f32 %v2040_v1 }
 0x3cf   : > { %1619 = vperm.xlu0 %2823, %v3509_v63   ;;  %v3521_v24 = vpop.eup %2872  ;;  %2892 = vpow2.f32 %v1597_v41 }
 0x3d0   : > { %1616 = vperm.xlu1 %2822, %v3499_v52   ;;  %v3528_v29 = vpop.eup %2874  ;;  %2894 = vpow2.f32 %v1599_v10 }
 0x3d1   : > { %v3530_v35 = vpop.eup %2876  ;;  %2896 = vpow2.f32 %v2046_v2 }
 0x3d2   : > { %v3537_v59 = vpop.eup %2878 }
 0x3d3   : > { %1622 = vperm.xlu0 %2823, %v3519_v33   ;;  %v3539_v56 = vpop.eup %2880 }
 0x3d4   : > { %2060 = vperm.xlu1 %2822, %v3511_v31   ;;  %v3546_v26 = vpop.eup %2882 }
 0x3d5   : > { %v3548_v57 = vpop.eup %2884 }
 0x3d6   : > { %v3553_v48 = vpop.eup %2886 }
 0x3d7   : > { %1625 = vperm.xlu0 %2823, %v3528_v29   ;;  %3953 = vst [vmem:[#allocation7_spill] sm:$0xff] %v3553_v48  ;;  %v3555_v44 = vpop.eup %2888 }
 0x3d8   : > { %1175 = vperm.xlu1 %2822, %v3521_v24   ;;  %v3559_v53 = vpop.eup %2890 }
 0x3d9   : > { %3954 = vst [vmem:[#allocation8_spill] sm:$0xff] %v3559_v53  ;;  %v3562_v25 = vpop.eup %2892 }
 0x3da   : > { %3955 = vst [vmem:[#allocation9_spill] sm:$0xff] %v3562_v25  ;;  %v3565_v61 = vpop.eup %2894 }
 0x3db   : > { %1184 = vperm.xlu0 %2823, %v3537_v59   ;;  %3956 = vst [vmem:[#allocation10_spill] sm:$0xff] %v3565_v61  ;;  %v3568_v34 = vpop.eup %2896 }
 0x3dc   : > { %2063 = vperm.xlu1 %2822, %v3530_v35   ;;  %3957 = vst [vmem:[#allocation11_spill] sm:$0xff] %v3568_v34 }
 0x3df   : > { %2072 = vperm.xlu0 %2823, %v3546_v26  }
 0x3e0   : > { %1178 = vperm.xlu1 %2822, %v3539_v56  }
 0x3e3   : > { %2075 = vperm.xlu0 %2823, %v3553_v48  }
 0x3e4   : > { %2066 = vperm.xlu1 %2822, %v3548_v57  }
 0x3e8   : > { %1181 = vperm.xlu1 %2822, %v3555_v44  }
 0x3ec   : > { %2069 = vperm.xlu1 %2822, %v3559_v53  }
 0x3f0   : > { %1628 = vperm.xlu1 %2822, %v3562_v25  }
 0x3f4   : > { %1631 = vperm.xlu1 %2822, %v3565_v61  }
 0x3f8   : > { %2078 = vperm.xlu1 %2822, %v3568_v34  }
 0x402   : > { %v709_v54 = vpop.permute.xlu1 %708 }
 0x403   : > { %v712_v62 = vpop.permute.xlu0 %711  ;;  %v734_v43 = vrot.slane %v709_v54, %v3202_v58 }
 0x404   : > { %v738_v22 = vrot.slane %v712_v62, %v3202_v58 }
 0x406   : > { %v715_v55 = vpop.permute.xlu1 %714  ;;  %v763_v47 = vsel %vm616_vm3, %v738_v22, %v734_v43 }
 0x407   : > { %v724_v60 = vpop.permute.xlu0 %723  ;;  %v742_v19 = vrot.slane %v715_v55, %v3202_v58 }
 0x408   : > { %v754_v41 = vrot.slane %v724_v60, %v3202_v58 }
 0x409   : > { %v764_v30 = vsel %vm618_vm4, %v742_v19, %v763_v47 }
 0x40a   : > { %v718_v40 = vpop.permute.xlu1 %717 }
 0x40b   : > { %v727_v39 = vpop.permute.xlu0 %726  ;;  %v746_v20 = vrot.slane %v718_v40, %v3202_v58 }
 0x40c   : > { %v758_v10 = vrot.slane %v727_v39, %v3202_v58 }
 0x40d   : > { %v765_v45 = vsel %vm620_vm5, %v746_v20, %v764_v30 }
 0x40e   : > { %v721_v23 = vpop.permute.xlu1 %720 }
 0x40f   : > { %v730_v1 = vpop.permute.xlu0 %729  ;;  %v750_v21 = vrot.slane %v721_v23, %v3202_v58 }
 0x410   : > { %v762_v2 = vrot.slane %v730_v1, %v3202_v58 }
 0x411   : > { %v766_v51 = vsel %vm622_vm6, %v750_v21, %v765_v45 }
 0x412   : > { %v767_v54 = vsel %vm624_vm7, %v754_v41, %v766_v51 }
 0x413   : > { %v768_v62 = vsel %vm626_vm8, %v758_v10, %v767_v54 }
 0x414   : > { %v769_v55 = vsel %vm628_vm9, %v762_v2, %v768_v62 }
 0x415   : > { %v771_v22 = vsel %vm549_vm2, %v769_v55, 0.0 }
 0x416   : > { %772 = vadd.xlane.f32.xlu0 %v771_v22 }
 0x43b   : > { %v1164_v43 = vpop.permute.xlu1 %1163 }
 0x43c   : > { %v1173_v20 = vpop.permute.xlu0 %1172  ;;  %v1189_v62 = vrot.slane %v1164_v43, %v3202_v58 }
 0x43d   : > { %v1201_v34 = vrot.slane %v1173_v20, %v3202_v58 }
 0x43f   : > { %v1167_v40 = vpop.permute.xlu1 %1166 }
 0x440   : > { %v1193_v10 = vrot.slane %v1167_v40, %v3202_v58 }
 0x442   : > { %v1218_v55 = vsel %vm616_vm3, %v1193_v10, %v1189_v62 }
 0x443   : > { %v1170_v60 = vpop.permute.xlu1 %1169 }
 0x444   : > { %v1197_v2 = vrot.slane %v1170_v60, %v3202_v58 }
 0x446   : > { %v1219_v4 = vsel %vm618_vm4, %v1197_v2, %v1218_v55 }
 0x447   : > { %v1611_v19 = vpop.permute.xlu1 %1610  ;;  %v1220_v40 = vsel %vm620_vm5, %v1201_v34, %v1219_v4 }
 0x448   : > { %v1636_v20 = vrot.slane %v1611_v19, %v3202_v58 }
 0x44a   : > { %v2058_v39 = vpop.permute.xlu0 %2057 }
 0x44b   : > { %v1614_v47 = vpop.permute.xlu1 %1613 }
 0x44c   : > { %v1640_v60 = vrot.slane %v1614_v47, %v3202_v58 }
 0x44e   : > { %v1620_v21 = vpop.permute.xlu0 %1619  ;;  %v1665_v34 = vsel %vm616_vm3, %v1640_v60, %v1636_v20 }
 0x44f   : > { %v1617_v23 = vpop.permute.xlu1 %1616 }
 0x450   : > { %v1644_v10 = vrot.slane %v1617_v23, %v3202_v58 }
 0x452   : > { %v1623_v45 = vpop.permute.xlu0 %1622 }
 0x453   : > { %v2061_v30 = vpop.permute.xlu1 %2060  ;;  %v1652_v55 = vrot.slane %v1623_v45, %v3202_v58 }
 0x454   : > { %v2087_v47 = vrot.slane %v2061_v30, %v3202_v58 }
 0x456   : > { %v1626_v54 = vpop.permute.xlu0 %1625 }
 0x457   : > { %v1176_v1 = vpop.permute.xlu1 %1175 }
 0x458   : > { %v1205_v14 = vrot.slane %v1176_v1, %v3202_v58 }
 0x45a   : > { %v1185_v25 = vpop.permute.xlu0 %1184  ;;  %v1221_v48 = vsel %vm622_vm6, %v1205_v14, %v1220_v40 }
 0x45b   : > { %v2064_v41 = vpop.permute.xlu1 %2063  ;;  %v1217_v2 = vrot.slane %v1185_v25, %v3202_v58  ;;  %v1648_v25 = vrot.slane %v1620_v21, %v3202_v58 }
 0x45c   : > { %v2091_v23 = vrot.slane %v2064_v41, %v3202_v58 }
 0x45f   : > { %v1179_v51 = vpop.permute.xlu1 %1178 }
 0x460   : > { %v1209_v61 = vrot.slane %v1179_v51, %v3202_v58 }
 0x462   : > { %v1222_v1 = vsel %vm624_vm7, %v1209_v61, %v1221_v48  ;;  %v2083_v48 = vrot.slane %v2058_v39, %v3202_v58  ;;  %v2073_v61 = vpop.permute.xlu0 %2072 }
 0x463   : > { %v2067_v22 = vpop.permute.xlu1 %2066  ;;  %v2103_v20 = vrot.slane %v2073_v61, %v3202_v58 }
 0x464   : > { %v2095_v19 = vrot.slane %v2067_v22, %v3202_v58 }
 0x467   : > { %v1182_v53 = vpop.permute.xlu1 %1181 }
 0x468   : > { %v1213_v43 = vrot.slane %v1182_v53, %v3202_v58  ;;  %v1666_v53 = vsel %vm618_vm4, %v1644_v10, %v1665_v34  ;;  %v1656_v10 = vrot.slane %v1626_v54, %v3202_v58 }
 0x469   : > { %v1667_v30 = vsel %vm620_vm5, %v1648_v25, %v1666_v53 }
 0x46a   : > { %v1223_v51 = vsel %vm626_vm8, %v1213_v43, %v1222_v1  ;;  %v2112_v43 = vsel %vm616_vm3, %v2087_v47, %v2083_v48 }
 0x46b   : > { %v2070_v62 = vpop.permute.xlu1 %2069  ;;  %v1224_v4 = vsel %vm628_vm9, %v1217_v2, %v1223_v51  ;;  %v2113_v41 = vsel %vm618_vm4, %v2091_v23, %v2112_v43  ;;  %v1668_v2 = vsel %vm622_vm6, %v1652_v55, %v1667_v30  ;;  %v2076_v51 = vpop.permute.xlu0 %2075 }
 0x46c   : > { %v1226_v14 = vsel %vm549_vm2, %v1224_v4, 0.0  ;;  %v2099_v40 = vrot.slane %v2070_v62, %v3202_v58  ;;  %v2114_v21 = vsel %vm620_vm5, %v2095_v19, %v2113_v41  ;;  %v1669_v1 = vsel %vm624_vm7, %v1656_v10, %v1668_v2 }
 0x46d   : > { %1227 = vadd.xlane.f32.xlu1 %v1226_v14  ;;  %v2107_v47 = vrot.slane %v2076_v51, %v3202_v58 }
 0x46e   : > { %v2115_v22 = vsel %vm622_vm6, %v2099_v40, %v2114_v21 }
 0x46f   : > { %v1629_v60 = vpop.permute.xlu1 %1628  ;;  %v2116_v34 = vsel %vm624_vm7, %v2103_v20, %v2115_v22 }
 0x470   : > { %v1660_v39 = vrot.slane %v1629_v60, %v3202_v58  ;;  %v2117_v48 = vsel %vm626_vm8, %v2107_v47, %v2116_v34 }
 0x472   : > { %v1670_v54 = vsel %vm626_vm8, %v1660_v39, %v1669_v1 }
 0x473   : > { %v1632_v45 = vpop.permute.xlu1 %1631 }
 0x474   : > { %v1664_v62 = vrot.slane %v1632_v45, %v3202_v58 }
 0x476   : > { %v1671_v4 = vsel %vm628_vm9, %v1664_v62, %v1670_v54 }
 0x477   : > { %v2079_v14 = vpop.permute.xlu1 %2078  ;;  %v1673_v53 = vsel %vm549_vm2, %v1671_v4, 0.0 }
 0x478   : > { %v2111_v23 = vrot.slane %v2079_v14, %v3202_v58  ;;  %1674 = vadd.xlane.f32.xlu0 %v1673_v53 }
 0x47a   : > { %v2118_v25 = vsel %vm628_vm9, %v2111_v23, %v2117_v48 }
 0x47b   : > { %v2120_v61 = vsel %vm549_vm2, %v2118_v25, 0.0  ;;  %vm1882_vm2 = vcmask 191616  }
 0x47c   : > { %2121 = vadd.xlane.f32.xlu0 %v2120_v61 }
 0x4a3   : > { %v773_v19 = vpop.xlane.xlu0 %772 }
 0x4a4   : > { %2898 = vrcp.f32 %v773_v19 }
 0x4ae   : > { %v2899_v55 = vpop.eup %2898 }
 0x4af   : > { %v779_v40 = vrot.slane %v2899_v55, %v3128_v28  ;;  %v783_v60 = vrot.slane %v2899_v55, %v3361_v8  ;;  %v787_v58 = vrot.slane %v2899_v55, %v3364_v9  ;;  %v799_v10 = vrot.slane %v2899_v55, %v3367_v12 }
 0x4b0   : > { %v791_v21 = vrot.slane %v2899_v55, %v3370_v13  ;;  %v803_v2 = vrot.slane %v2899_v55, %v3373_v15  ;;  %v795_v22 = vrot.slane %v2899_v55, %v3379_v38  ;;  %v807_v45 = vrot.slane %v2899_v55, %v3387_v50 }
 0x4b1   : > { %v816_v30 = vmul.f32 %v3397_v18, %v779_v40  ;;  %v817_v43 = vmul.f32 %v3399_v36, %v783_v60  ;;  %v818_v41 = vmul.f32 %v3403_v3, %v787_v58  ;;  %v821_v39 = vmul.f32 %v3405_v7, %v799_v10 }
 0x4b2   : > { %v819_v18 = vmul.f32 %v3409_v11, %v791_v21  ;;  %v822_v36 = vmul.f32 %v3411_v17, %v803_v2  ;;  %v820_v3 = vmul.f32 %v3415_v37, %v795_v22  ;;  %v823_v7 = vmul.f32 %v3417_v42, %v807_v45  ;;  %v3958_v21 = vld [vmem:[#allocation7_spill] sm:$0xff]  ;;  %v3959_v2 = vld [vmem:[#allocation8_spill] sm:$0xff] }
 0x4b3   : > { %826 = vperm.xlu1 %2822, %v816_v30   ;;  %831 = vperm.xlu0 %2823, %v817_v43  }
 0x4b7   : > { %836 = vperm.xlu1 %2822, %v818_v41   ;;  %851 = vperm.xlu0 %2823, %v821_v39  }
 0x4bb   : > { %841 = vperm.xlu1 %2822, %v819_v18   ;;  %856 = vperm.xlu0 %2823, %v822_v36  }
 0x4bf   : > { %846 = vperm.xlu1 %2822, %v820_v3   ;;  %861 = vperm.xlu0 %2823, %v823_v7  }
 0x4fa   : > { %v1228_v1 = vpop.xlane.xlu1 %1227 }
 0x4fb   : > { %2900 = vrcp.f32 %v1228_v1 }
 0x505   : > { %v2901_v20 = vpop.eup %2900  ;;  %v1675_v51 = vpop.xlane.xlu0 %1674 }
 0x506   : > { %2902 = vrcp.f32 %v1675_v51  ;;  %v1238_v11 = vrot.slane %v2901_v20, %v3361_v8  ;;  %v1234_v17 = vrot.slane %v2901_v20, %v3128_v28  ;;  %v1242_v4 = vrot.slane %v2901_v20, %v3364_v9 }
 0x507   : > { %v1246_v53 = vrot.slane %v2901_v20, %v3370_v13  ;;  %v1250_v40 = vrot.slane %v2901_v20, %v3379_v38  ;;  %v1254_v30 = vrot.slane %v2901_v20, %v3367_v12  ;;  %v1262_v43 = vrot.slane %v2901_v20, %v3387_v50 }
 0x508   : > { %v1272_v62 = vmul.f32 %v3459_v49, %v1238_v11  ;;  %v1271_v54 = vmul.f32 %v3447_v5, %v1234_v17  ;;  %v1273_v42 = vmul.f32 %v3470_v0, %v1242_v4  ;;  %v1258_v10 = vrot.slane %v2901_v20, %v3373_v15  ;;  %v3960_v20 = vld [vmem:[#allocation9_spill] sm:$0xff] }
 0x509   : > { %v2122_v37 = vpop.xlane.xlu0 %2121  ;;  %v1274_v0 = vmul.f32 %v3457_v46, %v1246_v53 }
 0x50a   : > { %2904 = vrcp.f32 %v2122_v37  ;;  %1286 = vperm.xlu0 %2823, %v1272_v62   ;;  %1281 = vperm.xlu1 %2822, %v1271_v54  }
 0x50e   : > { %1291 = vperm.xlu0 %2823, %v1273_v42  }
 0x510   : > { %v3657_v34 = vpop.eup %2902 }
 0x511   : > { %v1685_v47 = vrot.slane %v3657_v34, %v3361_v8  ;;  %v1681_v14 = vrot.slane %v3657_v34, %v3128_v28  ;;  %v1689_v23 = vrot.slane %v3657_v34, %v3364_v9  ;;  %v1693_v55 = vrot.slane %v3657_v34, %v3370_v13 }
 0x512   : > { %v1701_v60 = vrot.slane %v3657_v34, %v3367_v12  ;;  %v1709_v11 = vrot.slane %v3657_v34, %v3387_v50 }
 0x513   : > { %v1719_v49 = vmul.f32 %v3488_v6, %v1685_v47  ;;  %v1718_v5 = vmul.f32 %v3479_v27, %v1681_v14  ;;  %v1720_v25 = vmul.f32 %v3499_v52, %v1689_v23  ;;  %v1721_v46 = vmul.f32 %v3509_v63, %v1693_v55 }
 0x514   : > { %v3668_v48 = vpop.eup %2904  ;;  %v1723_v63 = vmul.f32 %v3528_v29, %v1701_v60 }
 0x515   : > { %1733 = vperm.xlu0 %2823, %v1719_v49   ;;  %1728 = vperm.xlu1 %2822, %v1718_v5   ;;  %v2128_v61 = vrot.slane %v3668_v48, %v3128_v28  ;;  %v2132_v6 = vrot.slane %v3668_v48, %v3361_v8  ;;  %v1275_v28 = vmul.f32 %v3521_v24, %v1250_v40 }
 0x516   : > { %v1697_v8 = vrot.slane %v3657_v34, %v3379_v38  ;;  %v2136_v52 = vrot.slane %v3668_v48, %v3364_v9  ;;  %v1276_v24 = vmul.f32 %v3539_v56, %v1254_v30  ;;  %v2140_v9 = vrot.slane %v3668_v48, %v3370_v13 }
 0x517   : > { %v2165_v27 = vmul.f32 %v3497_v32, %v2128_v61  ;;  %v2166_v19 = vmul.f32 %v3511_v31, %v2132_v6  ;;  %v2148_v58 = vrot.slane %v3668_v48, %v3367_v12  ;;  %v1277_v56 = vmul.f32 %v3555_v44, %v1258_v10 }
 0x518   : > { %v1722_v32 = vmul.f32 %v3519_v33, %v1697_v8  ;;  %v2167_v31 = vmul.f32 %v3530_v35, %v2136_v52  ;;  %v1278_v33 = vmul.f32 %v3537_v59, %v1262_v43  ;;  %v2168_v35 = vmul.f32 %v3548_v57, %v2140_v9  ;;  %v3962_v8 = vld [vmem:[#allocation11_spill] sm:$0xff] }
 0x519   : > { %1296 = vperm.xlu0 %2823, %v1274_v0   ;;  %1738 = vperm.xlu1 %2822, %v1720_v25   ;;  %v2170_v29 = vmul.f32 %v3546_v26, %v2148_v58  ;;  %v2152_v13 = vrot.slane %v3668_v48, %v3373_v15  ;;  %v2144_v41 = vrot.slane %v3668_v48, %v3379_v38  ;;  %v3961_v0 = vld [vmem:[#allocation10_spill] sm:$0xff] }
 0x51a   : > { %v1705_v12 = vrot.slane %v3657_v34, %v3373_v15  ;;  %v2156_v37 = vrot.slane %v3668_v48, %v3387_v50  ;;  %v1725_v25 = vmul.f32 %v3961_v0, %v1709_v11 }
 0x51b   : > { %v2171_v44 = vmul.f32 %v3958_v21, %v2152_v13  ;;  %v2169_v18 = vmul.f32 %v3959_v2, %v2144_v41 }
 0x51c   : > { %v1724_v51 = vmul.f32 %v3960_v20, %v1705_v12  ;;  %v2172_v52 = vmul.f32 %v3962_v8, %v2156_v37 }
 0x51d   : > { %2175 = vperm.xlu0 %2823, %v2165_v27   ;;  %2180 = vperm.xlu1 %2822, %v2166_v19  }
 0x521   : > { %1743 = vperm.xlu0 %2823, %v1721_v46   ;;  %1301 = vperm.xlu1 %2822, %v1275_v28  }
 0x525   : > { %1748 = vperm.xlu0 %2823, %v1722_v32   ;;  %2185 = vperm.xlu1 %2822, %v2167_v31  }
 0x529   : > { %1753 = vperm.xlu0 %2823, %v1723_v63   ;;  %1306 = vperm.xlu1 %2822, %v1276_v24  }
 0x52d   : > { %1316 = vperm.xlu0 %2823, %v1278_v33   ;;  %2190 = vperm.xlu1 %2822, %v2168_v35  }
 0x531   : > { %2200 = vperm.xlu0 %2823, %v2170_v29   ;;  %1311 = vperm.xlu1 %2822, %v1277_v56  }
 0x532   : > { %v832_v59 = vpop.permute.xlu0 %831  ;;  %v827_v57 = vpop.permute.xlu1 %826 }
 0x533   : > { %v865_v39 = vmul.f32 %v832_v59, %v3119_v16  ;;  %v864_v26 = vmul.f32 %v827_v57, %v3119_v16 }
 0x535   : > { %v880_v36 = vsel %vm872_vm10, %v865_v39, 0.0  ;;  %v873_v38 = vsel %vm872_vm10, %v864_v26, 0.0  ;;  %2205 = vperm.xlu0 %2823, %v2171_v44   ;;  %2195 = vperm.xlu1 %2822, %v2169_v18  }
 0x536   : > { %v881_v22 = vrot.slane %v880_v36, 4  ;;  %v874_v45 = vrot.slane %v873_v38, 4  ;;  %v852_v3 = vpop.permute.xlu0 %851  ;;  %v837_v7 = vpop.permute.xlu1 %836 }
 0x537   : > { %v869_v15 = vmul.f32 %v852_v3, %v3119_v16  ;;  %v866_v1 = vmul.f32 %v837_v7, %v3119_v16 }
 0x538   : > { %v882_v17 = vadd.f32 %v881_v22, %v880_v36  ;;  %v875_v62 = vadd.f32 %v874_v45, %v873_v38 }
 0x539   : > { %v908_v54 = vsel %vm872_vm10, %v869_v15, 0.0  ;;  %v887_v4 = vsel %vm872_vm10, %v866_v1, 0.0  ;;  %1758 = vperm.xlu1 %2822, %v1724_v51  }
 0x53a   : > { %v883_v42 = vrot.slane %v882_v17, 2  ;;  %v876_v47 = vrot.slane %v875_v62, 2  ;;  %v909_v14 = vrot.slane %v908_v54, 4  ;;  %v888_v49 = vrot.slane %v887_v4, 4  ;;  %v857_v5 = vpop.permute.xlu0 %856  ;;  %v842_v53 = vpop.permute.xlu1 %841 }
 0x53b   : > { %v870_v23 = vmul.f32 %v857_v5, %v3119_v16  ;;  %v867_v34 = vmul.f32 %v842_v53, %v3119_v16 }
 0x53c   : > { %v884_v61 = vadd.f32 %v883_v42, %v882_v17  ;;  %v877_v6 = vadd.f32 %v876_v47, %v875_v62  ;;  %v910_v27 = vadd.f32 %v909_v14, %v908_v54  ;;  %v889_v19 = vadd.f32 %v888_v49, %v887_v4 }
 0x53d   : > { %v915_v55 = vsel %vm872_vm10, %v870_v23, 0.0  ;;  %v894_v50 = vsel %vm872_vm10, %v867_v34, 0.0  ;;  %1763 = vperm.xlu1 %2822, %v1725_v25  }
 0x53e   : > { %v911_v48 = vrot.slane %v910_v27, 2  ;;  %v890_v40 = vrot.slane %v889_v19, 2  ;;  %v862_v46 = vpop.permute.xlu0 %861  ;;  %v847_v28 = vpop.permute.xlu1 %846  ;;  %v916_v32 = vrot.slane %v915_v55, 4  ;;  %v895_v31 = vrot.slane %v894_v50, 4 }
 0x53f   : > { %v871_v60 = vmul.f32 %v862_v46, %v3119_v16  ;;  %v868_v30 = vmul.f32 %v847_v28, %v3119_v16  ;;  %v885_v63 = vrot.slane %v884_v61, 1  ;;  %v878_v24 = vrot.slane %v877_v6, 1 }
 0x540   : > { %v891_v43 = vadd.f32 %v890_v40, %v889_v19  ;;  %v917_v9 = vadd.f32 %v916_v32, %v915_v55  ;;  %v896_v33 = vadd.f32 %v895_v31, %v894_v50  ;;  %v912_v10 = vadd.f32 %v911_v48, %v910_v27 }
 0x541   : > { %v922_v35 = vsel %vm872_vm10, %v871_v60, 0.0  ;;  %v901_v58 = vsel %vm872_vm10, %v868_v30, 0.0  ;;  %2210 = vperm.xlu1 %2822, %v2172_v52   ;;  %v886_v57 = vadd.f32 %v885_v63, %v884_v61  ;;  %v879_v12 = vadd.f32 %v878_v24, %v877_v6 }
 0x542   : > { %v892_v29 = vrot.slane %v891_v43, 1  ;;  %v918_v56 = vrot.slane %v917_v9, 2  ;;  %v897_v13 = vrot.slane %v896_v33, 2  ;;  %v923_v41 = vrot.slane %v922_v35, 4 }
 0x543   : > { %v902_v59 = vrot.slane %v901_v58, 4  ;;  %v913_v18 = vrot.slane %v912_v10, 1  ;;  %v2690_v3 = vpack.c.bf16 %v886_v57, %v886_v57  ;;  %v2689_v7 = vpack.c.bf16 %v879_v12, %v879_v12 }
 0x544   : > { %v893_v39 = vadd.f32 %v892_v29, %v891_v43  ;;  %v919_v26 = vadd.f32 %v918_v56, %v917_v9  ;;  %v898_v21 = vadd.f32 %v897_v13, %v896_v33  ;;  %v924_v44 = vadd.f32 %v923_v41, %v922_v35 }
 0x545   : > { %v903_v2 = vadd.f32 %v902_v59, %v901_v58  ;;  %v914_v11 = vadd.f32 %v913_v18, %v912_v10  ;;  %v962_v37 = vunpack.c.l.b16 %v2690_v3  ;;  %v961_v42 = vunpack.c.l.b16 %v2689_v7 }
 0x546   : > { %v920_v36 = vrot.slane %v919_v26, 1  ;;  %v899_v38 = vrot.slane %v898_v21, 1  ;;  %v925_v22 = vrot.slane %v924_v44, 2  ;;  %v2691_v15 = vpack.c.bf16 %v893_v39, %v893_v39 }
 0x547   : > { %v904_v45 = vrot.slane %v903_v2, 2  ;;  %v2694_v5 = vpack.c.bf16 %v914_v11, %v914_v11  ;;  %v969_v0 = vsel %vm616_vm3, %v962_v37, %v961_v42 }
 0x548   : > { %v900_v1 = vadd.f32 %v899_v38, %v898_v21  ;;  %v926_v20 = vadd.f32 %v925_v22, %v924_v44  ;;  %v921_v17 = vadd.f32 %v920_v36, %v919_v26  ;;  %v963_v47 = vunpack.c.l.b16 %v2691_v15 }
 0x549   : > { %v905_v51 = vadd.f32 %v904_v45, %v903_v2  ;;  %v966_v27 = vunpack.c.l.b16 %v2694_v5 }
 0x54a   : > { %v2692_v62 = vpack.c.bf16 %v900_v1, %v900_v1  ;;  %v927_v54 = vrot.slane %v926_v20, 1  ;;  %v2695_v23 = vpack.c.bf16 %v921_v17, %v921_v17  ;;  %v970_v61 = vsel %vm618_vm4, %v963_v47, %v969_v0 }
 0x54b   : > { %v906_v4 = vrot.slane %v905_v51, 1 }
 0x54c   : > { %v928_v14 = vadd.f32 %v927_v54, %v926_v20  ;;  %v964_v53 = vunpack.c.l.b16 %v2692_v62  ;;  %v967_v55 = vunpack.c.l.b16 %v2695_v23 }
 0x54d   : > { %v907_v49 = vadd.f32 %v906_v4, %v905_v51 }
 0x54e   : > { %v2696_v25 = vpack.c.bf16 %v928_v14, %v928_v14  ;;  %v971_v19 = vsel %vm620_vm5, %v964_v53, %v970_v61 }
 0x54f   : > { %v2693_v34 = vpack.c.bf16 %v907_v49, %v907_v49 }
 0x550   : > { %v968_v48 = vunpack.c.l.b16 %v2696_v25 }
 0x551   : > { %v965_v6 = vunpack.c.l.b16 %v2693_v34 }
 0x553   : > { %v972_v50 = vsel %vm622_vm6, %v965_v6, %v971_v19 }
 0x554   : > { %v973_v40 = vsel %vm624_vm7, %v966_v27, %v972_v50 }
 0x555   : > { %v974_v46 = vsel %vm626_vm8, %v967_v55, %v973_v40 }
 0x556   : > { %v975_v28 = vsel %vm628_vm9, %v968_v48, %v974_v46 }
 0x557   : > { %v976_v8 = vpack.c.b16 %v975_v28, %v975_v28 }
 0x559   : > { %977 = vrot.lane.b32.xlu0 %v976_v8, %s2979_s18 }
 0x589   : > { %v1287_v52 = vpop.permute.xlu0 %1286  ;;  %v1282_v32 = vpop.permute.xlu1 %1281 }
 0x58a   : > { %v1320_v31 = vmul.f32 %v1287_v52, %v3119_v16  ;;  %v1319_v60 = vmul.f32 %v1282_v32, %v3119_v16 }
 0x58c   : > { %v1335_v30 = vsel %vm1327_vm11, %v1320_v31, 0.0  ;;  %v1328_v63 = vsel %vm1327_vm11, %v1319_v60, 0.0 }
 0x58d   : > { %v1336_v24 = vrot.slane %v1335_v30, 4  ;;  %v1329_v43 = vrot.slane %v1328_v63, 4  ;;  %v1292_v9 = vpop.permute.xlu0 %1291 }
 0x58e   : > { %v1321_v33 = vmul.f32 %v1292_v9, %v3119_v16 }
 0x58f   : > { %v1337_v35 = vadd.f32 %v1336_v24, %v1335_v30  ;;  %v1330_v10 = vadd.f32 %v1329_v43, %v1328_v63 }
 0x590   : > { %v1342_v58 = vsel %vm1327_vm11, %v1321_v33, 0.0 }
 0x591   : > { %v1343_v29 = vrot.slane %v1342_v58, 4  ;;  %v1338_v13 = vrot.slane %v1337_v35, 2  ;;  %v1331_v57 = vrot.slane %v1330_v10, 2 }
 0x593   : > { %v1344_v56 = vadd.f32 %v1343_v29, %v1342_v58  ;;  %v1339_v44 = vadd.f32 %v1338_v13, %v1337_v35  ;;  %v1332_v22 = vadd.f32 %v1331_v57, %v1330_v10 }
 0x594   : > { %v1734_v41 = vpop.permute.xlu0 %1733  ;;  %v1729_v59 = vpop.permute.xlu1 %1728 }
 0x595   : > { %v1767_v12 = vmul.f32 %v1734_v41, %v3119_v16  ;;  %v1766_v39 = vmul.f32 %v1729_v59, %v3119_v16  ;;  %v1345_v26 = vrot.slane %v1344_v56, 2  ;;  %v1340_v51 = vrot.slane %v1339_v44, 1 }
 0x596   : > { %v1333_v37 = vrot.slane %v1332_v22, 1 }
 0x597   : > { %v1782_v21 = vsel %vm1774_vm12, %v1767_v12, 0.0  ;;  %v1775_v18 = vsel %vm1774_vm12, %v1766_v39, 0.0  ;;  %v1346_v1 = vadd.f32 %v1345_v26, %v1344_v56  ;;  %v1341_v25 = vadd.f32 %v1340_v51, %v1339_v44 }
 0x598   : > { %v1783_v2 = vrot.slane %v1782_v21, 4  ;;  %v1297_v36 = vpop.permute.xlu0 %1296  ;;  %v1739_v38 = vpop.permute.xlu1 %1738  ;;  %v1776_v45 = vrot.slane %v1775_v18, 4  ;;  %v1334_v50 = vadd.f32 %v1333_v37, %v1332_v22 }
 0x599   : > { %v1322_v7 = vmul.f32 %v1297_v36, %v3119_v16  ;;  %v1768_v15 = vmul.f32 %v1739_v38, %v3119_v16  ;;  %v1347_v23 = vrot.slane %v1346_v1, 1  ;;  %v2698_v58 = vpack.c.bf16 %v1341_v25, %v1341_v25 }
 0x59a   : > { %v1784_v3 = vadd.f32 %v1783_v2, %v1782_v21  ;;  %v1777_v20 = vadd.f32 %v1776_v45, %v1775_v18  ;;  %v2697_v10 = vpack.c.bf16 %v1334_v50, %v1334_v50 }
 0x59b   : > { %v1349_v17 = vsel %vm1327_vm11, %v1322_v7, 0.0  ;;  %v1789_v62 = vsel %vm1774_vm12, %v1768_v15, 0.0  ;;  %v1348_v31 = vadd.f32 %v1347_v23, %v1346_v1  ;;  %v1417_v38 = vunpack.c.l.b16 %v2698_v58 }
 0x59c   : > { %v1785_v11 = vrot.slane %v1784_v3, 2  ;;  %v2176_v54 = vpop.permute.xlu0 %2175  ;;  %v2181_v4 = vpop.permute.xlu1 %2180  ;;  %v1778_v42 = vrot.slane %v1777_v20, 2  ;;  %v1350_v47 = vrot.slane %v1349_v17, 4  ;;  %v1790_v49 = vrot.slane %v1789_v62, 4 }
 0x59d   : > { %v2213_v5 = vmul.f32 %v2176_v54, %v3119_v16  ;;  %v2214_v53 = vmul.f32 %v2181_v4, %v3119_v16  ;;  %v2699_v57 = vpack.c.bf16 %v1348_v31, %v1348_v31  ;;  %v1416_v22 = vunpack.c.l.b16 %v2697_v10 }
 0x59e   : > { %v1786_v14 = vadd.f32 %v1785_v11, %v1784_v3  ;;  %v1779_v34 = vadd.f32 %v1778_v42, %v1777_v20  ;;  %v1351_v0 = vadd.f32 %v1350_v47, %v1349_v17  ;;  %v1791_v61 = vadd.f32 %v1790_v49, %v1789_v62 }
 0x59f   : > { %v2222_v6 = vsel %vm2221_vm13, %v2213_v5, 0.0  ;;  %v2229_v27 = vsel %vm2221_vm13, %v2214_v53, 0.0  ;;  %v1418_v20 = vunpack.c.l.b16 %v2699_v57  ;;  %v1424_v47 = vsel %vm616_vm3, %v1417_v38, %v1416_v22 }
 0x5a0   : > { %v1744_v19 = vpop.permute.xlu0 %1743  ;;  %v1302_v55 = vpop.permute.xlu1 %1301  ;;  %v1787_v48 = vrot.slane %v1786_v14, 1  ;;  %v1352_v40 = vrot.slane %v1351_v0, 2  ;;  %v2223_v46 = vrot.slane %v2222_v6, 4  ;;  %v1780_v28 = vrot.slane %v1779_v34, 1 }
 0x5a1   : > { %v1792_v8 = vrot.slane %v1791_v61, 2  ;;  %v2230_v52 = vrot.slane %v2229_v27, 4  ;;  %v1769_v32 = vmul.f32 %v1744_v19, %v3119_v16  ;;  %v1323_v63 = vmul.f32 %v1302_v55, %v3119_v16 }
 0x5a2   : > { %v1353_v60 = vadd.f32 %v1352_v40, %v1351_v0  ;;  %v2224_v30 = vadd.f32 %v2223_v46, %v2222_v6  ;;  %v1788_v29 = vadd.f32 %v1787_v48, %v1786_v14  ;;  %v1781_v13 = vadd.f32 %v1780_v28, %v1779_v34 }
 0x5a3   : > { %v1793_v24 = vadd.f32 %v1792_v8, %v1791_v61  ;;  %v2231_v43 = vadd.f32 %v2230_v52, %v2229_v27  ;;  %v1796_v9 = vsel %vm1774_vm12, %v1769_v32, 0.0  ;;  %v1356_v59 = vsel %vm1327_vm11, %v1323_v63, 0.0 }
 0x5a4   : > { %v1749_v33 = vpop.permute.xlu0 %1748  ;;  %v2186_v35 = vpop.permute.xlu1 %2185  ;;  %v1797_v56 = vrot.slane %v1796_v9, 4  ;;  %v1354_v41 = vrot.slane %v1353_v60, 1  ;;  %v2225_v12 = vrot.slane %v2224_v30, 2  ;;  %v1357_v44 = vrot.slane %v1356_v59, 4 }
 0x5a5   : > { %v1794_v26 = vrot.slane %v1793_v24, 1  ;;  %v2232_v21 = vrot.slane %v2231_v43, 2  ;;  %v1770_v2 = vmul.f32 %v1749_v33, %v3119_v16  ;;  %v2706_v45 = vpack.c.bf16 %v1788_v29, %v1788_v29 }
 0x5a6   : > { %v1798_v39 = vadd.f32 %v1797_v56, %v1796_v9  ;;  %v2705_v3 = vpack.c.bf16 %v1781_v13, %v1781_v13  ;;  %v1355_v7 = vadd.f32 %v1354_v41, %v1353_v60  ;;  %v1358_v15 = vadd.f32 %v1357_v44, %v1356_v59 }
 0x5a7   : > { %v1803_v1 = vsel %vm1774_vm12, %v1770_v2, 0.0  ;;  %v2226_v51 = vadd.f32 %v2225_v12, %v2224_v30  ;;  %v1795_v62 = vadd.f32 %v1794_v26, %v1793_v24  ;;  %v2233_v54 = vadd.f32 %v2232_v21, %v2231_v43 }
 0x5a8   : > { %v1754_v18 = vpop.permute.xlu0 %1753  ;;  %v1307_v36 = vpop.permute.xlu1 %1306  ;;  %v1799_v11 = vrot.slane %v1798_v39, 2  ;;  %v1804_v17 = vrot.slane %v1803_v1, 4  ;;  %v1359_v4 = vrot.slane %v1358_v15, 2  ;;  %v2215_v37 = vmul.f32 %v2186_v35, %v3119_v16 }
 0x5a9   : > { %v1864_v14 = vunpack.c.l.b16 %v2706_v45  ;;  %v1863_v5 = vunpack.c.l.b16 %v2705_v3  ;;  %v2700_v53 = vpack.c.bf16 %v1355_v7, %v1355_v7  ;;  %v1425_v25 = vsel %vm618_vm4, %v1418_v20, %v1424_v47 }
 0x5aa   : > { %v1805_v49 = vadd.f32 %v1804_v17, %v1803_v1  ;;  %v1360_v23 = vadd.f32 %v1359_v4, %v1358_v15  ;;  %v2236_v34 = vsel %vm2221_vm13, %v2215_v37, 0.0  ;;  %v2227_v61 = vrot.slane %v2226_v51, 1 }
 0x5ab   : > { %v1800_v6 = vadd.f32 %v1799_v11, %v1798_v39  ;;  %v2237_v27 = vrot.slane %v2236_v34, 4  ;;  %v2707_v19 = vpack.c.bf16 %v1795_v62, %v1795_v62  ;;  %v2234_v55 = vrot.slane %v2233_v54, 1 }
 0x5ac   : > { %v2191_v42 = vpop.permute.xlu1 %2190  ;;  %v1317_v0 = vpop.permute.xlu0 %1316  ;;  %v1771_v50 = vmul.f32 %v1754_v18, %v3119_v16  ;;  %v1324_v48 = vmul.f32 %v1307_v36, %v3119_v16  ;;  %v1361_v46 = vrot.slane %v1360_v23, 1  ;;  %v1806_v28 = vrot.slane %v1805_v49, 2 }
 0x5ad   : > { %v2238_v8 = vadd.f32 %v2237_v27, %v2236_v34  ;;  %v1326_v52 = vmul.f32 %v1317_v0, %v3119_v16  ;;  %v1871_v32 = vsel %vm616_vm3, %v1864_v14, %v1863_v5  ;;  %v1419_v31 = vunpack.c.l.b16 %v2700_v53 }
 0x5ae   : > { %v1810_v60 = vsel %vm1774_vm12, %v1771_v50, 0.0  ;;  %v1363_v30 = vsel %vm1327_vm11, %v1324_v48, 0.0  ;;  %v2228_v63 = vadd.f32 %v2227_v61, %v2226_v51  ;;  %v1801_v24 = vrot.slane %v1800_v6, 1 }
 0x5af   : > { %v2239_v43 = vrot.slane %v2238_v8, 2  ;;  %v1811_v9 = vrot.slane %v1810_v60, 4  ;;  %v1865_v33 = vunpack.c.l.b16 %v2707_v19  ;;  %v1364_v35 = vrot.slane %v1363_v30, 4 }
 0x5b0   : > { %v1312_v40 = vpop.permute.xlu1 %1311  ;;  %v1377_v58 = vsel %vm1327_vm11, %v1326_v52, 0.0  ;;  %v2216_v10 = vmul.f32 %v2191_v42, %v3119_v16  ;;  %v2235_v56 = vadd.f32 %v2234_v55, %v2233_v54  ;;  %v1362_v13 = vadd.f32 %v1361_v46, %v1360_v23  ;;  %v2201_v57 = vpop.permute.xlu0 %2200 }
 0x5b1   : > { %v1807_v41 = vadd.f32 %v1806_v28, %v1805_v49  ;;  %v2240_v59 = vadd.f32 %v2239_v43, %v2238_v8  ;;  %v1426_v12 = vsel %vm620_vm5, %v1419_v31, %v1425_v25  ;;  %v1365_v39 = vadd.f32 %v1364_v35, %v1363_v30 }
 0x5b2   : > { %v1378_v26 = vrot.slane %v1377_v58, 4  ;;  %v2243_v21 = vsel %vm2221_vm13, %v2216_v10, 0.0  ;;  %v2713_v44 = vpack.c.bf16 %v2228_v63, %v2228_v63  ;;  %v1802_v2 = vadd.f32 %v1801_v24, %v1800_v6 }
 0x5b3   : > { %v1812_v18 = vadd.f32 %v1811_v9, %v1810_v60  ;;  %v2244_v36 = vrot.slane %v2243_v21, 4  ;;  %v3782_v38 = vsel %vm618_vm4, %v1865_v33, %v1871_v32  ;;  %v1366_v22 = vrot.slane %v1365_v39, 2 }
 0x5b4   : > { %v2196_v29 = vpop.permute.xlu1 %2195  ;;  %v1379_v45 = vadd.f32 %v1378_v26, %v1377_v58  ;;  %v2218_v3 = vmul.f32 %v2201_v57, %v3119_v16  ;;  %v2701_v15 = vpack.c.bf16 %v1362_v13, %v1362_v13  ;;  %v1808_v1 = vrot.slane %v1807_v41, 1  ;;  %v2206_v14 = vpop.permute.xlu0 %2205 }
 0x5b5   : > { %v2241_v20 = vrot.slane %v2240_v59, 1  ;;  %v2245_v51 = vadd.f32 %v2244_v36, %v2243_v21  ;;  %v1367_v11 = vadd.f32 %v1366_v22, %v1365_v39  ;;  %v1325_v54 = vmul.f32 %v1312_v40, %v3119_v16 }
 0x5b6   : > { %v1380_v17 = vrot.slane %v1379_v45, 2  ;;  %v2257_v62 = vsel %vm2221_vm13, %v2218_v3, 0.0  ;;  %v2714_v4 = vpack.c.bf16 %v2235_v56, %v2235_v56  ;;  %v2708_v37 = vpack.c.bf16 %v1802_v2, %v1802_v2 }
 0x5b7   : > { %v1813_v42 = vrot.slane %v1812_v18, 2  ;;  %v2246_v47 = vrot.slane %v2245_v51, 2  ;;  %v1368_v49 = vrot.slane %v1367_v11, 1  ;;  %v2258_v53 = vrot.slane %v2257_v62, 4 }
 0x5b8   : > { %v1759_v7 = vpop.permute.xlu1 %1758  ;;  %v1381_v5 = vadd.f32 %v1380_v17, %v1379_v45  ;;  %v1370_v23 = vsel %vm1327_vm11, %v1325_v54, 0.0  ;;  %v1420_v34 = vunpack.c.l.b16 %v2701_v15  ;;  %v3788_v0 = vadd.f32 %v1808_v1, %v1807_v41 }
 0x5b9   : > { %v2247_v25 = vadd.f32 %v2246_v47, %v2245_v51  ;;  %v1371_v61 = vrot.slane %v1370_v23, 4  ;;  %v3790_v27 = vadd.f32 %v2241_v20, %v2240_v59  ;;  %v1369_v19 = vadd.f32 %v1368_v49, %v1367_v11 }
 0x5ba   : > { %v2259_v55 = vadd.f32 %v2258_v53, %v2257_v62  ;;  %v2219_v50 = vmul.f32 %v2206_v14, %v3119_v16  ;;  %v3793_v48 = vunpack.c.l.b16 %v2713_v44  ;;  %v3795_v40 = vunpack.c.l.b16 %v2714_v4 }
 0x5bb   : > { %v1382_v46 = vrot.slane %v1381_v5, 1  ;;  %v1372_v28 = vadd.f32 %v1371_v61, %v1370_v23  ;;  %v3797_v8 = vunpack.c.l.b16 %v2708_v37  ;;  %v1814_v52 = vadd.f32 %v1813_v42, %v1812_v18 }
 0x5bc   : > { %v1764_v6 = vpop.permute.xlu1 %1763  ;;  %v2260_v32 = vrot.slane %v2259_v55, 2  ;;  %v2264_v31 = vsel %vm2221_vm13, %v2219_v50, 0.0  ;;  %v2709_v60 = vpack.c.bf16 %v3788_v0, %v3788_v0  ;;  %v2248_v30 = vrot.slane %v2247_v25, 1 }
 0x5bd   : > { %v1373_v63 = vrot.slane %v1372_v28, 2  ;;  %v2265_v24 = vrot.slane %v2264_v31, 4  ;;  %v1427_v43 = vsel %vm622_vm6, %v1420_v34, %v1426_v12  ;;  %v2715_v9 = vpack.c.bf16 %v3790_v27, %v3790_v27 }
 0x5be   : > { %v2702_v33 = vpack.c.bf16 %v1369_v19, %v1369_v19  ;;  %v2217_v35 = vmul.f32 %v2196_v29, %v3119_v16  ;;  %v1383_v58 = vadd.f32 %v1382_v46, %v1381_v5  ;;  %v1772_v13 = vmul.f32 %v1759_v7, %v3119_v16 }
 0x5bf   : > { %v1374_v10 = vadd.f32 %v1373_v63, %v1372_v28  ;;  %v2266_v56 = vadd.f32 %v2265_v24, %v2264_v31  ;;  %v1815_v59 = vrot.slane %v1814_v52, 1  ;;  %v2261_v57 = vadd.f32 %v2260_v32, %v2259_v55 }
 0x5c0   : > { %v2211_v41 = vpop.permute.xlu1 %2210  ;;  %v2250_v39 = vsel %vm2221_vm13, %v2217_v35, 0.0  ;;  %v1773_v26 = vmul.f32 %v1764_v6, %v3119_v16  ;;  %v2249_v21 = vadd.f32 %v2248_v30, %v2247_v25  ;;  %v1421_v18 = vunpack.c.l.b16 %v2702_v33 }
 0x5c1   : > { %v1375_v12 = vrot.slane %v1374_v10, 1  ;;  %v2267_v44 = vrot.slane %v2266_v56, 2  ;;  %v2251_v2 = vrot.slane %v2250_v39, 4  ;;  %v1817_v36 = vsel %vm1774_vm12, %v1772_v13, 0.0 }
 0x5c2   : > { %v1824_v29 = vsel %vm1774_vm12, %v1773_v26, 0.0  ;;  %v2220_v22 = vmul.f32 %v2211_v41, %v3119_v16  ;;  %v2704_v45 = vpack.c.bf16 %v1383_v58, %v1383_v58  ;;  %v2262_v1 = vrot.slane %v2261_v57, 1 }
 0x5c3   : > { %v1376_v3 = vadd.f32 %v1375_v12, %v1374_v10  ;;  %v2268_v7 = vadd.f32 %v2267_v44, %v2266_v56  ;;  %v2252_v15 = vadd.f32 %v2251_v2, %v2250_v39  ;;  %v1818_v20 = vrot.slane %v1817_v36, 4 }
 0x5c4   : > { %v1825_v51 = vrot.slane %v1824_v29, 4  ;;  %v2271_v11 = vsel %vm2221_vm13, %v2220_v22, 0.0  ;;  %v1816_v17 = vadd.f32 %v1815_v59, %v1814_v52  ;;  %v2716_v37 = vpack.c.bf16 %v2249_v21, %v2249_v21 }
 0x5c5   : > { %v2703_v62 = vpack.c.bf16 %v1376_v3, %v1376_v3  ;;  %v2253_v54 = vrot.slane %v2252_v15, 2  ;;  %v2272_v4 = vrot.slane %v2271_v11, 4  ;;  %v2269_v42 = vrot.slane %v2268_v7, 1 }
 0x5c6   : > { %v1819_v47 = vadd.f32 %v1818_v20, %v1817_v36  ;;  %v1826_v14 = vadd.f32 %v1825_v51, %v1824_v29  ;;  %v1423_v49 = vunpack.c.l.b16 %v2704_v45  ;;  %v2263_v34 = vadd.f32 %v2262_v1, %v2261_v57 }
 0x5c7   : > { %v1422_v5 = vunpack.c.l.b16 %v2703_v62  ;;  %v2254_v16 = vadd.f32 %v2253_v54, %v2252_v15  ;;  %v2273_v53 = vadd.f32 %v2272_v4, %v2271_v11  ;;  %v1428_v6 = vsel %vm624_vm7, %v1421_v18, %v1427_v43  ;;  %v2828_v11 = vld [vmem:[%s3937_s6] sm:$0xff]  }
 0x5c8   : > { %v1820_v25 = vrot.slane %v1819_v47, 2  ;;  %v1827_v61 = vrot.slane %v1826_v14, 2  ;;  %v2312_v27 = vunpack.c.l.b16 %v2715_v9  ;;  %v2270_v46 = vadd.f32 %v2269_v42, %v2268_v7  ;;  %v2826_v9 = vld [vmem:[%s3935_s4] sm:$0xff]   ;;  %2752 = vmatpush3.bf16.msra.mxu0 %v2828_v11 }
 0x5c9   : > { %v2255_v19 = vrot.slane %v2254_v16, 1  ;;  %v2274_v55 = vrot.slane %v2273_v53, 2  ;;  %v1429_v50 = vsel %vm626_vm8, %v1422_v5, %v1428_v6  ;;  %v2710_v31 = vpack.c.bf16 %v1816_v17, %v1816_v17  ;;  %2744 = vmatpush3.bf16.msra.mxu1 %v2826_v9  ;;  %v2830_v5 = vld [vmem:[%s3939_s8] sm:$0xff]  }
 0x5ca   : > { %v1821_v28 = vadd.f32 %v1820_v25, %v1819_v47  ;;  %v1828_v52 = vadd.f32 %v1827_v61, %v1826_v14  ;;  %v1430_v32 = vsel %vm628_vm9, %v1423_v49, %v1429_v50  ;;  %v2313_v33 = vunpack.c.l.b16 %v2716_v37  ;;  %v2829_v49 = vld [vmem:[%s3937_s6 + $0x8] sm:$0xff]   ;;  %v2832_v50 = vld [vmem:[%s3939_s8 + $0x10] sm:$0xff]  }
 0x5cb   : > { %v978_v23 = vpop.permute.xlu0 %977  ;;  %v2256_v30 = vadd.f32 %v2255_v19, %v2254_v16  ;;  %v2275_v63 = vadd.f32 %v2274_v55, %v2273_v53  ;;  %v1431_v24 = vpack.c.b16 %v1430_v32, %v1430_v32  ;;  %v2718_v35 = vpack.c.bf16 %v2263_v34, %v2263_v34  ;;  %v2831_v16 = vld [vmem:[%s3939_s8 + $0x8] sm:$0xff]   ;;  %v2671_v53 = vld [vmem:[%s3936_s5] ss:$0 sm:$0xff] }
 0x5cc   : > { %981 = vst.msk [vmem:[#allocation2] sm:$0xf] %vm980_vm14, %v978_v23  ;;  %v1822_v58 = vrot.slane %v1821_v28, 1  ;;  %v1829_v43 = vrot.slane %v1828_v52, 1  ;;  %v2318_v10 = vsel %vm616_vm3, %v3795_v40, %v3793_v48  ;;  %v1867_v56 = vunpack.c.l.b16 %v2709_v60  ;;  %v2827_v48 = vld [vmem:[%s3935_s4 + $0x8] sm:$0xff]  }
 0x5cd   : > { %v2717_v13 = vpack.c.bf16 %v2256_v30, %v2256_v30  ;;  %v2276_v41 = vrot.slane %v2275_v63, 1  ;;  %1432 = vrot.lane.b32.xlu1 %v1431_v24, %s2979_s18  ;;  %v1873_v59 = vsel %vm620_vm5, %v3797_v8, %v3782_v38  ;;  %v2719_v57 = vpack.c.bf16 %v2270_v46, %v2270_v46  ;;  %v3964_v23 = vld [vmem:[#allocation6_spill] sm:$0xff]  ;;  %v2833_v46 = vld [vmem:[%s3939_s8 + $0x18] sm:$0xff]  }
 0x5ce   : > { %v1823_v39 = vadd.f32 %v1822_v58, %v1821_v28  ;;  %v1830_v26 = vadd.f32 %v1829_v43, %v1828_v52  ;;  %v2319_v40 = vsel %vm618_vm4, %v2312_v27, %v2318_v10  ;;  %v1868_v0 = vunpack.c.l.b16 %v2710_v31  ;;  %v2675_v28 = vld [vmem:[%s3938_s7] ss:$0 sm:$0xff] }
 0x5cf   : > { %v2314_v60 = vunpack.c.l.b16 %v2717_v13  ;;  %v2277_v21 = vadd.f32 %v2276_v41, %v2275_v63  ;;  %v3963_v12 = vmov 0.0   ;;  %v2320_v44 = vsel %vm620_vm5, %v2313_v33, %v2319_v40 }
 0x5d0   : > { %2745 = vmatprep.subr.bf16.mxu1 %v3963_v12  ;;  %v2315_v2 = vunpack.c.l.b16 %v2718_v35  ;;  %v2711_v18 = vpack.c.bf16 %v1823_v39, %v1823_v39  ;;  %v2712_v38 = vpack.c.bf16 %v1830_v26, %v1830_v26  ;;  %v1874_v8 = vsel %vm622_vm6, %v1867_v56, %v1873_v59  ;;  %2753 = vmatprep.subr.bf16.mxu0 %v3963_v12  ;;  %v2679_v35 = vld [vmem:[%s3940_s9] ss:$0 sm:$0xff] }
 0x5d1   : > { %v2321_v36 = vsel %vm622_vm6, %v2314_v60, %v2320_v44  ;;  %v2720_v29 = vpack.c.bf16 %v2277_v21, %v2277_v21  ;;  %v2316_v22 = vunpack.c.l.b16 %v2719_v57  ;;  %2746 = vmatpush3.bf16.msra.mxu1 %v2827_v48  ;;  %v1875_v1 = vsel %vm624_vm7, %v1868_v0, %v1874_v8  ;;  %2754 = vmatpush3.bf16.msra.mxu0 %v2829_v49 }
 0x5d2   : > { %v1869_v45 = vunpack.c.l.b16 %v2711_v18  ;;  %v1870_v3 = vunpack.c.l.b16 %v2712_v38  ;;  %v2322_v7 = vsel %vm624_vm7, %v2315_v2, %v2321_v36  ;;  %2759 = vmatprep.subr.bf16.mxu1 %v3963_v12  ;;  %vm2329_vm3 = vcmask 257216  }
 0x5d3   : > { %v2317_v15 = vunpack.c.l.b16 %v2720_v29  ;;  %v2323_v51 = vsel %vm626_vm8, %v2316_v22, %v2322_v7  ;;  %v2338_v34 = vadd.f32 %v2671_v53, %v3964_v23 }
 0x5d4   : > { %v1876_v20 = vsel %vm626_vm8, %v1869_v45, %v1875_v1 }
 0x5d5   : > { %v1877_v17 = vsel %vm628_vm9, %v1870_v3, %v1876_v20  ;;  %v2324_v62 = vsel %vm628_vm9, %v2317_v15, %v2323_v51 }
 0x5d6   : > { %v1878_v54 = vpack.c.b16 %v1877_v17, %v1877_v17  ;;  %v2325_v4 = vpack.c.b16 %v2324_v62, %v2324_v62 }
 0x5d8   : > { %1879 = vrot.lane.b32.xlu0 %v1878_v54, %s2979_s18  ;;  %2326 = vrot.lane.b32.xlu1 %v2325_v4, %s2979_s18  ;;  %s2631_s18 = sshll.u32 %s348_s12, 3 }
 0x5d9   : > { %s350_s26 = scalar_lea.vmem [#allocation3], %s2631_s18  ;;  %s2980_s18 = smov [#allocation3]  }
 0x5da   : > { %s2568_s27 = sshll.u32 %s350_s26, 4  ;;  %s2910_s20 = sshll.u32 %s2980_s18, 4  ;;  %s3890_s27 = int_to_ptr.vmem [resolvable:$true] %s2568_s27  ;;  %s2911_s20 = int_to_ptr.vmem [resolvable:$false] %s2910_s20 }
 0x5db   : > { %s2906_s11 = scalar_lea.vmem %s3890_s27, 128  ;;  %s2912_s21 = scalar_lea.vmem %s2911_s20, 256 }
 0x5dc   : > { %p2907_p11 = scmp.ne.s32.totalorder %s3890_s27, %s2906_s11  ;;  %p2913_p0 = scmp.lt.s32.totalorder %s3890_s27, %s2911_s20 }
 0x5dd   : > { %p2914_p1 = scmp.lt.s32.totalorder %s2912_s21, %s2906_s11 }
 0x5de   : > { %p2908_p12 = pnand %p2907_p11, %p3074_p5 }
 0x5df   : > { %p2915_p2 = por %p2914_p1, %p2913_p0 }
 0x5e0   : > { %p2909_p13 = pneg %p2908_p12 }
 0x5e2   : > { %p2916_p3 = pnand %p2915_p2, %p2909_p13 }
 0x63f   : > { %v1433_v37 = vpop.permute.xlu1 %1432 }
 0x640   : > { %1436 = vst.msk [vmem:[#allocation2] sm:$0xf] %vm1435_vm15, %v1433_v37 }
 0x64a   : > { %v1880_v42 = vpop.permute.xlu0 %1879  ;;  %v2327_v47 = vpop.permute.xlu1 %2326 }
 0x64b   : > { %1883 = vst.msk [vmem:[#allocation2] sm:$0xf] %vm1882_vm2, %v1880_v42 }
 0x64c   : > { %2330 = vst.msk [vmem:[#allocation2] sm:$0xf] %vm2329_vm3, %v2327_v47 }
 0x653   : > { %v2339_v14 = vld [vmem:[#allocation2] sm:$0xf] }
 0x654   : > { %2748 = vmatmul.mubr.msk.bf16.vlgmr.msra.gmra.mrb[0].mxu1 %vm404_vm1, %v2339_v14 }
 0x655   : > { %2767 = vmatprep.mubr.msk.bf16.mxu1 %vm2973_vm0, %v3963_v12  ;;  %2760 = vmatpush3.bf16.msra.mxu1 %v2830_v5  ;;  %vm2508_vm0 = vcmask 523264  }
 0x656   : > { %2761 = vmatprep.subr.bf16.mxu1 %v3963_v12 }
 0x659   : > { %2762 = vmatpush3.bf16.msra.mxu1 %v2831_v16 }
 0x65a   : > { %2763 = vmatprep.subr.bf16.mxu1 %v3963_v12 }
 0x65d   : > { %2764 = vmatpush3.bf16.msra.mxu1 %v2832_v50 }
 0x65e   : > { %2765 = vmatprep.subr.bf16.mxu1 %v3963_v12 }
 0x661   : > { %2766 = vmatpush3.bf16.msra.mxu1 %v2833_v46 }
 0x727   : > { %v2393_v25 = vpop.f32.mrb[0].mxu1 }
 0x728   : > { %v2399_v61 = vadd.f32 %v2393_v25, %v2338_v34  ;;  %v2749_v6 = vpop.f32.mrb[1].mxu1 }
 0x729   : > { %v2396_v27 = vpop.f32.mrb[2].mxu1 }
 0x72a   : > { %v2400_v19 = vpack.c.bf16 %v2399_v61, %v2399_v61  ;;  %v2750_v55 = vpop.f32.mrb[3].mxu1 }
 0x72c   : > { %2756 = vmatmul.mubr.msk.bf16.vlgmr.msra.gmra.mrb[4].mxu0 %vm404_vm1, %v2400_v19 }
 0x7ff   : > { %v2461_v52 = vpop.f32.mrb[4].mxu0 }
 0x800   : > { %v2462_v32 = vadd.f32 %v2675_v28, %v2461_v52  ;;  %v2757_v31 = vpop.f32.mrb[5].mxu0 }
 0x801   : > { %v2464_v30 = vpop.f32.mrb[6].mxu0 }
 0x802   : > { %v2467_v63 = vmax.f32 %v2462_v32, 0.0  ;;  %v2758_v24 = vpop.f32.mrb[7].mxu0 }
 0x804   : > { %v2468_v33 = vpack.c.bf16 %v2467_v63, %v2467_v63 }
 0x806   : > { %2768 = vmatmul.mubr.msk.bf16.vlgmr.msra.gmra.mrb[4].mxu1 %vm2508_vm0, %v2468_v33 }
 0x8d9   : > { %v2546_v58 = vpop.f32.mrb[4].mxu1 }
 0x8da   : > { %v2547_v43 = vadd.f32 %v2679_v35, %v2546_v58  ;;  %v2769_v9 = vpop.f32.mrb[5].mxu1 }
 0x8db   : > { %v2549_v10 = vpop.f32.mrb[6].mxu1 }
 0x8dc   : > { %v2552_v56 = vadd.f32 %v2547_v43, %v2399_v61  ;;  %v2770_v13 = vpop.f32.mrb[7].mxu1 }
 0x8de   : > { %2553 = vst.msk [vmem:[%s350_s26] sm:$0xff] %vm404_vm1, %v2552_v56 }
 0x8df   : > { %2919 = shalt.err (!%p2916_p3)
}
 0x8e0   : > { %s2920_s12 = scalar_lea.hbm %s3888_s30, 128  ;;  %s2924_s28 = scalar_lea.hbm %s3941_s10, 256 }
 0x8e1   : > { %p2921_p4 = scmp.ne.s32.totalorder %s3888_s30, %s2920_s12  ;;  %p2925_p9 = scmp.lt.u32.totalorder %s3888_s30, %s3941_s10 }
 0x8e2   : > { %p2926_p10 = scmp.lt.u32.totalorder %s2924_s28, %s2920_s12  ;;  %p2928_p12 = scmp.lt.u32.totalorder %s2920_s12, %s3888_s30 }
 0x8e3   : > { %p2922_p7 = pnand %p2921_p4, %p3074_p5 }
 0x8e4   : > { %p2927_p11 = por %p2926_p10, %p2925_p9 }
 0x8e5   : > { %p2923_p8 = pneg %p2922_p7 }
 0x8e6   : > { %p2929_p13 = por %p2928_p12, %p2927_p11 }
 0x8e8   : > { %p2930_p0 = pnand %p2929_p13, %p2923_p8 }
 0x8ea   : > { %2933 = shalt.err (!%p2930_p0)
}
 0x8eb   : > { %2771 = dma.vmem_to_hbm [thread:$0]  (%p3074_p5), %s3890_s27, 128, %s3888_s30, %s2555_s17  }
 0x8ec PF: > { %p2777_p1 = scmp.ge.s32.totalorder %s2968_s16, 2  ;;  %s2580_s11 = sand.u32 1, %s2956_s13  }
 0x8ed   : > { %s2581_s20 = scalar_lea.sflag [#allocation4], %s2580_s11 }
 0x8ee   : > { %p2774_p2 = pnand %p2777_p1, %p3078_p6 }
 0x8f0   : > { %2951 = dma.done.wait (!%p2774_p2), %s2581_s20, 128  }
 0x8f1   : > { %2953 = vsyncadd (!%p2774_p2), %s2581_s20, 4294967168  ;;  %p20_p3 = scmp.ge.s32.totalorder %s3061_s19, 4   ;;  %s3965_s13 = smov %s2960_s14 }
 0x8f2   : > { %s3966_s14 = smov %s2964_s15  ;;  %s3967_s15 = smov %s3072_s22 }
 0x8f3   : > { %s3968_s16 = smov %s3061_s19  ;;  %22 = sbr.rel (!%p20_p3) target bundleno = 3 (0x3), region = 95 }
 0x8fa   :  { %2586 = vsyncpa [#allocation4], 1 }
 0x8fb   :  { %2588 = vsyncpa [#allocation4 + $0x1], 1 }

</bundles_post_ra>
